<compile_context>
chip_gen: v6e
topology: v6e:2x2x1
jax: 0.10.0
libtpu: 0.0.40
codegen_flags: <defaults>
</compile_context>

<pallas_src>
import functools

import jax
import jax.numpy as jnp
from jax.experimental import pallas as pl
from jax.experimental.pallas import tpu as pltpu


# ----------------------------- tiling helpers --------------------------------

def _tile_rows(dim, target):
    """Row (second-to-last) tile: multiple of 8 dividing dim, or the full dim."""
    if dim < 8 or dim % 8 != 0:
        return dim
    t = min(target, dim)
    t = (t // 8) * 8
    while dim % t != 0:
        t -= 8
    return t


def _tile_last(dim, target):
    """Lane (last) tile: multiple of 128 dividing dim, or the full dim."""
    if dim < 128 or dim % 128 != 0:
        return dim
    t = min(target, dim)
    t = (t // 128) * 128
    while dim % t != 0:
        t -= 128
    return t


_TM = 512      # row tile for matmuls (review: cut weight re-fetch)
_TM_LN = 512   # row tile for pure layernorm
_TN = 512      # output-lane tile
_TK = 1536     # reduction tile (full K for D<=1536; 1536 for K=3072 down-proj)
_TQ = 256      # attention query tile
_TKV = 512     # attention kv tile
_VMEM_LIMIT = 48 * 1024 * 1024   # clears v5e's 16 MiB default, < v7x's 64 MiB


# ----------------------------- kernels ---------------------------------------

def _apply_activation(y, activation):
    if activation == "relu":
        return jnp.maximum(y, 0.0)
    if activation == "gelu":
        # TODO(synk): HF BERT uses exact erf-GELU; tanh approximation keeps the
        # lowering on the EUP tanh path.
        return 0.5 * y * (1.0 + jnp.tanh(0.7978845608028654 * (y + 0.044715 * y * y * y)))
    if activation == "tanh":
        return jnp.tanh(y)
    return y


def _dense_kernel(x_ref, w_ref, b_ref, o_ref, acc_ref, *, activation):
    """out[i,j] = act(sum_k x[i,k] @ w[k,j] + b[j]); K is grid axis 2."""
    k = pl.program_id(2)

    @pl.when(k == 0)
    def _():
        acc_ref[...] = jnp.zeros_like(acc_ref)

    acc_ref[...] += jnp.dot(x_ref[...], w_ref[...],
                            preferred_element_type=jnp.float32)

    @pl.when(k == pl.num_programs(2) - 1)
    def _():
        y = acc_ref[...] + b_ref[...].astype(jnp.float32)
        o_ref[...] = _apply_activation(y, activation).astype(o_ref.dtype)


def _dense_res_ln_kernel(x_ref, w_ref, b_ref, r_ref, g_ref, beta_ref,
                         o_ref, acc_ref, *, eps):
    """out = LayerNorm(x @ w + b + residual); K is grid axis 1 (full N per tile)."""
    k = pl.program_id(1)

    @pl.when(k == 0)
    def _():
        acc_ref[...] = jnp.zeros_like(acc_ref)

    acc_ref[...] += jnp.dot(x_ref[...], w_ref[...],
                            preferred_element_type=jnp.float32)

    @pl.when(k == pl.num_programs(1) - 1)
    def _():
        y = (acc_ref[...] + b_ref[...].astype(jnp.float32)
             + r_ref[...].astype(jnp.float32))
        mean = jnp.mean(y, axis=-1, keepdims=True)
        yc = y - mean
        var = jnp.mean(yc * yc, axis=-1, keepdims=True)
        out = (yc * jax.lax.rsqrt(var + eps) * g_ref[...].astype(jnp.float32)
               + beta_ref[...].astype(jnp.float32))
        o_ref[...] = out.astype(o_ref.dtype)


def _layernorm_kernel(x_ref, g_ref, b_ref, o_ref, *, eps):
    x = x_ref[...].astype(jnp.float32)
    mean = jnp.mean(x, axis=-1, keepdims=True)
    xc = x - mean
    var = jnp.mean(xc * xc, axis=-1, keepdims=True)
    out = (xc * jax.lax.rsqrt(var + eps) * g_ref[...].astype(jnp.float32)
           + b_ref[...].astype(jnp.float32))
    o_ref[...] = out.astype(o_ref.dtype)


def _attn_single_kernel(q_ref, k_ref, v_ref, bias_ref, o_ref, *, scale, n_heads):
    """One-shot softmax attention (S fits in one kv tile), all heads per step.

    q_ref: (1, H, tq, dh); k_ref/v_ref: (1, H, S, dh); bias_ref: (1, 1, S);
    o_ref: (1, tq, H*dh)  -- lane-dense output slab.
    """
    dh = q_ref.shape[-1]
    q = q_ref[0] * scale                       # pre-scale q once (exact: pow2)
    k = k_ref[0]
    v = v_ref[0]
    # TODO(synk): on v6e/v7x the exp below could run in bf16 (EUP 2x rate);
    # kept f32 so the same kernel is numerically safe on v5e.
    s = jnp.einsum('hqd,hkd->hqk', q, k,
                   preferred_element_type=jnp.float32)          # (H, tq, S)
    s = s + bias_ref[0]                                          # (1,S) broadcast
    m = jnp.max(s, axis=-1, keepdims=True)
    p = jnp.exp(s - m)
    l = jnp.sum(p, axis=-1, keepdims=True)
    ctx = jnp.einsum('hqk,hkd->hqd', p.astype(v.dtype), v,
                     preferred_element_type=jnp.float32)         # (H, tq, dh)
    ctx = ctx * pl.reciprocal(l, approx=True)
    for h in range(n_heads):                                     # merge heads ->
        o_ref[0, :, h * dh:(h + 1) * dh] = ctx[h].astype(o_ref.dtype)


def _flash_attn_kernel(q_ref, k_ref, v_ref, bias_ref, o_ref,
                       m_sc, l_sc, acc_sc, *, scale, n_heads):
    """Online-softmax attention; kv tiles on grid axis 2; all heads per step."""
    dh = q_ref.shape[-1]
    ki = pl.program_id(2)

    @pl.when(ki == 0)
    def _():
        m_sc[...] = jnp.full(m_sc.shape, -jnp.inf, dtype=m_sc.dtype)
        l_sc[...] = jnp.zeros_like(l_sc)
        acc_sc[...] = jnp.zeros_like(acc_sc)

    q = q_ref[0] * scale                       # (H, tq, dh)
    k = k_ref[0]                               # (H, tkv, dh)
    v = v_ref[0]

    s = jnp.einsum('hqd,hkd->hqk', q, k,
                   preferred_element_type=jnp.float32)           # (H, tq, tkv)
    s = s + bias_ref[0]

    m_prev = m_sc[...]
    m_new = jnp.maximum(m_prev, jnp.max(s, axis=-1, keepdims=True))
    alpha = jnp.exp(m_prev - m_new)
    p = jnp.exp(s - m_new)

    l_sc[...] = alpha * l_sc[...] + jnp.sum(p, axis=-1, keepdims=True)
    acc_sc[...] = alpha * acc_sc[...] + jnp.einsum(
        'hqk,hkd->hqd', p.astype(v.dtype), v,
        preferred_element_type=jnp.float32)
    m_sc[...] = m_new

    @pl.when(ki == pl.num_programs(2) - 1)
    def _():
        ctx = acc_sc[...] * pl.reciprocal(l_sc[...], approx=True)
        for h in range(n_heads):
            o_ref[0, :, h * dh:(h + 1) * dh] = ctx[h].astype(o_ref.dtype)


def _pooler_head_kernel(cls_ref, pw_ref, pb_ref, g_ref, b_ref,
                        w1_ref, b1_ref, w2_ref, b2_ref, w3_ref, b3_ref,
                        o_ref, *, eps):
    """Fused BERT pooler (tanh) + LayerNorm + 3x(Linear+ReLU) classifier head."""
    cls = cls_ref[...]                                            # (B, D) bf16
    pooled = jnp.tanh(jnp.dot(cls, pw_ref[...], preferred_element_type=jnp.float32)
                      + pb_ref[...].astype(jnp.float32))          # (B, D) f32
    mean = jnp.mean(pooled, axis=-1, keepdims=True)
    yc = pooled - mean
    var = jnp.mean(yc * yc, axis=-1, keepdims=True)
    z = (yc * jax.lax.rsqrt(var + eps) * g_ref[...].astype(jnp.float32)
         + b_ref[...].astype(jnp.float32))
    z = jnp.maximum(jnp.dot(z.astype(w1_ref.dtype), w1_ref[...],
                            preferred_element_type=jnp.float32)
                    + b1_ref[...].astype(jnp.float32), 0.0)
    z = jnp.maximum(jnp.dot(z.astype(w2_ref.dtype), w2_ref[...],
                            preferred_element_type=jnp.float32)
                    + b2_ref[...].astype(jnp.float32), 0.0)
    z = jnp.maximum(jnp.dot(z.astype(w3_ref.dtype), w3_ref[...],
                            preferred_element_type=jnp.float32)
                    + b3_ref[...].astype(jnp.float32), 0.0)
    # TODO(synk): nn.Dropout is identity at inference; training-mode dropout not implemented.
    o_ref[...] = z.astype(o_ref.dtype)


# --------------------------- pallas wrappers ----------------------------------

def dense(x, w, b, activation="none", out_dtype=None):
    M, K = x.shape
    _, N = w.shape
    out_dtype = out_dtype if out_dtype is not None else x.dtype
    tm = _tile_rows(M, _TM)
    tn = _tile_last(N, _TN)
    tk = _tile_last(K, _TK)
    grid = (M // tm, N // tn, K // tk)
    return pl.pallas_call(
        functools.partial(_dense_kernel, activation=activation),
        out_shape=jax.ShapeDtypeStruct((M, N), out_dtype),
        grid_spec=pltpu.PrefetchScalarGridSpec(
            num_scalar_prefetch=0, grid=grid,
            in_specs=[
                pl.BlockSpec((tm, tk), lambda i, j, k: (i, k)),
                pl.BlockSpec((tk, tn), lambda i, j, k: (k, j)),
                pl.BlockSpec((1, tn), lambda i, j, k: (0, j)),
            ],
            out_specs=pl.BlockSpec((tm, tn), lambda i, j, k: (i, j)),
            scratch_shapes=[pltpu.VMEM((tm, tn), jnp.float32)]),
        compiler_params=pltpu.CompilerParams(
            dimension_semantics=("parallel", "parallel", "arbitrary"),
            vmem_limit_bytes=_VMEM_LIMIT),
    )(x, w, b.reshape(1, N))


def dense_residual_layernorm(x, w, b, residual, gamma, beta, eps, out_dtype=None):
    M, K = x.shape
    _, N = w.shape
    out_dtype = out_dtype if out_dtype is not None else residual.dtype
    tm = _tile_rows(M, _TM)
    tk = _tile_last(K, _TK)
    grid = (M // tm, K // tk)
    return pl.pallas_call(
        functools.partial(_dense_res_ln_kernel, eps=eps),
        out_shape=jax.ShapeDtypeStruct((M, N), out_dtype),
        grid_spec=pltpu.PrefetchScalarGridSpec(
            num_scalar_prefetch=0, grid=grid,
            in_specs=[
                pl.BlockSpec((tm, tk), lambda i, k: (i, k)),
                pl.BlockSpec((tk, N), lambda i, k: (k, 0)),
                pl.BlockSpec((1, N), lambda i, k: (0, 0)),
                pl.BlockSpec((tm, N), lambda i, k: (i, 0)),
                pl.BlockSpec((1, N), lambda i, k: (0, 0)),
                pl.BlockSpec((1, N), lambda i, k: (0, 0)),
            ],
            out_specs=pl.BlockSpec((tm, N), lambda i, k: (i, 0)),
            scratch_shapes=[pltpu.VMEM((tm, N), jnp.float32)]),
        compiler_params=pltpu.CompilerParams(
            dimension_semantics=("parallel", "arbitrary"),
            vmem_limit_bytes=_VMEM_LIMIT),
    )(x, w, b.reshape(1, N), residual, gamma.reshape(1, N), beta.reshape(1, N))


def layernorm(x, g, b, eps, out_dtype=None):
    M, D = x.shape
    out_dtype = out_dtype if out_dtype is not None else x.dtype
    tm = _tile_rows(M, _TM_LN)
    grid = (M // tm,)
    return pl.pallas_call(
        functools.partial(_layernorm_kernel, eps=eps),
        out_shape=jax.ShapeDtypeStruct((M, D), out_dtype),
        grid_spec=pltpu.PrefetchScalarGridSpec(
            num_scalar_prefetch=0, grid=grid,
            in_specs=[
                pl.BlockSpec((tm, D), lambda i: (i, 0)),
                pl.BlockSpec((1, D), lambda i: (0, 0)),
                pl.BlockSpec((1, D), lambda i: (0, 0)),
            ],
            out_specs=pl.BlockSpec((tm, D), lambda i: (i, 0))),
        compiler_params=pltpu.CompilerParams(
            dimension_semantics=("parallel",)),
    )(x, g.reshape(1, D), b.reshape(1, D))


def attention(q, k, v, bias, scale):
    """q,k,v: [B, H, S, dh] bf16; bias: [B, 1, S] f32 additive mask.

    Returns a lane-dense [B, S, H*dh] context slab (heads merged in-kernel)."""
    B, H, S, dh = q.shape
    D = H * dh
    tq = _tile_rows(S, _TQ)
    tkv = _tile_last(S, _TKV)

    if S == tkv:
        # Single kv tile (covers bert-base S=512 and the demo): one-shot softmax.
        grid = (B, S // tq)
        return pl.pallas_call(
            functools.partial(_attn_single_kernel, scale=scale, n_heads=H),
            out_shape=jax.ShapeDtypeStruct((B, S, D), q.dtype),
            grid_spec=pltpu.PrefetchScalarGridSpec(
                num_scalar_prefetch=0, grid=grid,
                in_specs=[
                    pl.BlockSpec((1, H, tq, dh), lambda b, qi: (b, 0, qi, 0)),
                    pl.BlockSpec((1, H, S, dh), lambda b, qi: (b, 0, 0, 0)),
                    pl.BlockSpec((1, H, S, dh), lambda b, qi: (b, 0, 0, 0)),
                    pl.BlockSpec((1, 1, S), lambda b, qi: (b, 0, 0)),
                ],
                out_specs=pl.BlockSpec((1, tq, D), lambda b, qi: (b, qi, 0))),
            compiler_params=pltpu.CompilerParams(
                dimension_semantics=("parallel", "parallel"),
                vmem_limit_bytes=_VMEM_LIMIT),
        )(q, k, v, bias)

    # General online-softmax path (S > tkv).
    grid = (B, S // tq, S // tkv)
    return pl.pallas_call(
        functools.partial(_flash_attn_kernel, scale=scale, n_heads=H),
        out_shape=jax.ShapeDtypeStruct((B, S, D), q.dtype),
        grid_spec=pltpu.PrefetchScalarGridSpec(
            num_scalar_prefetch=0, grid=grid,
            in_specs=[
                pl.BlockSpec((1, H, tq, dh), lambda b, qi, ki: (b, 0, qi, 0)),
                pl.BlockSpec((1, H, tkv, dh), lambda b, qi, ki: (b, 0, ki, 0)),
                pl.BlockSpec((1, H, tkv, dh), lambda b, qi, ki: (b, 0, ki, 0)),
                pl.BlockSpec((1, 1, tkv), lambda b, qi, ki: (b, 0, ki)),
            ],
            out_specs=pl.BlockSpec((1, tq, D), lambda b, qi, ki: (b, qi, 0)),
            scratch_shapes=[pltpu.VMEM((H, tq, 1), jnp.float32),
                            pltpu.VMEM((H, tq, 1), jnp.float32),
                            pltpu.VMEM((H, tq, dh), jnp.float32)]),
        compiler_params=pltpu.CompilerParams(
            dimension_semantics=("parallel", "parallel", "arbitrary"),
            vmem_limit_bytes=_VMEM_LIMIT),
    )(q, k, v, bias)


def pooler_classifier_head(cls, params):
    """Single one-step kernel: pooler tanh + LayerNorm + 3x(Linear+ReLU)."""
    B, D = cls.shape
    F = params["fc_w1"].shape[1]

    def spec(shape):
        return pl.BlockSpec(shape, lambda i: (0, 0))

    # TODO(synk): at bert-base dims the resident head weights are ~30 MB bf16;
    # raise vmem_limit_bytes for that config (or leave this tail to XLA).
    return pl.pallas_call(
        functools.partial(_pooler_head_kernel, eps=1e-5),
        out_shape=jax.ShapeDtypeStruct((B, D), jnp.float32),
        grid_spec=pltpu.PrefetchScalarGridSpec(
            num_scalar_prefetch=0, grid=(1,),
            in_specs=[
                spec((B, D)),
                spec((D, D)), spec((1, D)),
                spec((1, D)), spec((1, D)),
                spec((D, F)), spec((1, F)),
                spec((F, F)), spec((1, F)),
                spec((F, D)), spec((1, D)),
            ],
            out_specs=spec((B, D))),
        compiler_params=pltpu.CompilerParams(
            dimension_semantics=("arbitrary",)),
    )(cls.astype(jnp.bfloat16),
      params["pool_w"], params["pool_b"].reshape(1, D),
      params["fc_ln_g"].reshape(1, D), params["fc_ln_b"].reshape(1, D),
      params["fc_w1"], params["fc_b1"].reshape(1, F),
      params["fc_w2"], params["fc_b2"].reshape(1, F),
      params["fc_w3"], params["fc_b3"].reshape(1, D))


# ------------------------------ model -----------------------------------------

def init_params(cfg, key):
    D, F, V, P = cfg["d_model"], cfg["d_ff"], cfg["vocab"], cfg["max_pos"]
    keys = iter(jax.random.split(key, 64))

    def w_bf16(shape):
        return (0.02 * jax.random.normal(next(keys), shape, jnp.float32)
                ).astype(jnp.bfloat16)

    def w_f32(shape):
        return 0.02 * jax.random.normal(next(keys), shape, jnp.float32)

    params = dict(
        word_emb=w_f32((V, D)), pos_emb=w_f32((P, D)), type_emb=w_f32((2, D)),
        emb_ln_g=jnp.ones((D,), jnp.float32), emb_ln_b=jnp.zeros((D,), jnp.float32),
        pool_w=w_bf16((D, D)), pool_b=jnp.zeros((D,), jnp.float32),
        fc_ln_g=jnp.ones((D,), jnp.float32), fc_ln_b=jnp.zeros((D,), jnp.float32),
        fc_w1=w_bf16((D, F)), fc_b1=jnp.zeros((F,), jnp.float32),
        fc_w2=w_bf16((F, F)), fc_b2=jnp.zeros((F,), jnp.float32),
        fc_w3=w_bf16((F, D)), fc_b3=jnp.zeros((D,), jnp.float32),
        layers=[],
    )
    for _ in range(cfg["n_layers"]):
        params["layers"].append(dict(
            wqkv=w_bf16((D, 3 * D)), bqkv=jnp.zeros((3 * D,), jnp.float32),
            wo=w_bf16((D, D)), bo=jnp.zeros((D,), jnp.float32),
            ln1_g=jnp.ones((D,), jnp.float32), ln1_b=jnp.zeros((D,), jnp.float32),
            wi=w_bf16((D, F)), bi=jnp.zeros((F,), jnp.float32),
            wo2=w_bf16((F, D)), bo2=jnp.zeros((D,), jnp.float32),
            ln2_g=jnp.ones((D,), jnp.float32), ln2_b=jnp.zeros((D,), jnp.float32),
        ))
    return params


def bert_classifier_forward(params, ids, attention_mask, cfg):
    B, S = ids.shape
    D, H = cfg["d_model"], cfg["n_heads"]
    dh = D // H
    M = B * S

    # --- embeddings (gather is glue; LN statistics computed on the f32 sum) ---
    we = params["word_emb"][ids]                       # [B,S,D]
    pe = params["pos_emb"][jnp.arange(S)]              # [S,D]
    te = params["type_emb"][0]                         # [D]  (token_type_ids = 0)
    emb = (we + pe[None, :, :] + te[None, None, :]).reshape(M, D)   # f32
    h = layernorm(emb, params["emb_ln_g"], params["emb_ln_b"],
                  eps=1e-12, out_dtype=jnp.bfloat16)

    # Tiny [B,1,S] additive bias; head/query broadcast happens inside the kernel.
    attn_bias = ((1.0 - attention_mask.astype(jnp.float32)) * -1e9).reshape(B, 1, S)

    scale = 1.0 / (dh ** 0.5)

    # --- transformer encoder layers ---
    for layer in params["layers"]:
        # fused QKV projection: one [D, 3D] matmul
        qkv = dense(h, layer["wqkv"], layer["bqkv"])   # [M, 3D] bf16
        # TODO(synk): head-split transpose kept as JAX glue; folding it into the
        # kernel needs sub-128-lane re-layouts of the QKV slab (dh < 128).
        qkv = (qkv.reshape(B, S, 3, H, dh)
               .transpose(2, 0, 3, 1, 4))               # (3, B, H, S, dh)
        # attention writes a lane-dense [B,S,D] slab; no output transpose needed.
        ctx = attention(qkv[0], qkv[1], qkv[2], attn_bias, scale).reshape(M, D)

        # fused: out-proj + bias + residual + LayerNorm
        h = dense_residual_layernorm(ctx, layer["wo"], layer["bo"], h,
                                     layer["ln1_g"], layer["ln1_b"], eps=1e-12)
        # fused: FFN up-proj + GELU
        ff = dense(h, layer["wi"], layer["bi"], activation="gelu")
        # fused: FFN down-proj + bias + residual + LayerNorm
        h = dense_residual_layernorm(ff, layer["wo2"], layer["bo2"], h,
                                     layer["ln2_g"], layer["ln2_b"], eps=1e-12)

    # --- fused pooler (bert(...)[1]) + classifier head in one kernel ---
    cls = h.reshape(B, S, D)[:, 0, :]                   # [B,D]
    return pooler_classifier_head(cls, params)          # [B,D] f32


# ------------------------------- main ------------------------------------------

if __name__ == "__main__":
    cfg = dict(vocab=100, d_model=32, n_heads=2, n_layers=2, d_ff=128, max_pos=64)
    B, S = 2, 8

    key = jax.random.PRNGKey(0)
    k_ids, k_params = jax.random.split(key)

    ids = jax.random.randint(k_ids, (B, S), 0, cfg["vocab"], dtype=jnp.int32)
    attention_mask = jnp.ones((B, S), jnp.float32).at[1, 6:].set(0.0)

    params = init_params(cfg, k_params)

    fwd = jax.jit(functools.partial(bert_classifier_forward, cfg=cfg))
    out = fwd(params, ids, attention_mask)
    out = jax.block_until_ready(out)
    assert out.shape == (B, cfg["d_model"]) and out.dtype == jnp.float32
    print("KERNEL_OK")
</pallas_src>

<mosaic_0001>
module attributes {stable_mosaic.version = 11 : i64} {
  func.func @_layernorm_kernel(%arg0: i32, %arg1: memref<16x32xf32, #tpu.memory_space<vmem>>, %arg2: memref<1x32xf32, #tpu.memory_space<vmem>>, %arg3: memref<1x32xf32, #tpu.memory_space<vmem>>, %arg4: memref<16x32xbf16, #tpu.memory_space<vmem>>) attributes {dimension_semantics = [#tpu.dimension_semantics<parallel>], iteration_bounds = array<i64: 1>, scalar_prefetch = 0 : i64, scratch_operands = 0 : i64, tpu.core_type = #tpu.core_type<tc>, window_params = [{transform_indices = @transform_0, window_bounds = array<i64: 16, 32>}, {pipeline_mode = #tpu.pipeline_mode<synchronous>, transform_indices = @transform_1, window_bounds = array<i64: 1, 32>}, {pipeline_mode = #tpu.pipeline_mode<synchronous>, transform_indices = @transform_2, window_bounds = array<i64: 1, 32>}, {transform_indices = @transform_3, window_bounds = array<i64: 16, 32>}]} {
    %c0 = arith.constant 0 : index
    %c0_0 = arith.constant 0 : index
    %0 = vector.load %arg1[%c0, %c0_0] : memref<16x32xf32, #tpu.memory_space<vmem>>, vector<16x32xf32>
    %cst = arith.constant dense<0.000000e+00> : vector<16xf32>
    %1 = vector.multi_reduction <add>, %0, %cst [1] : vector<16x32xf32> to vector<16xf32>
    %2 = vector.shape_cast %1 : vector<16xf32> to vector<16x1xf32>
    %cst_1 = arith.constant 3.200000e+01 : f32
    %3 = vector.broadcast %cst_1 : f32 to vector<16x1xf32>
    %4 = arith.divf %2, %3 : vector<16x1xf32>
    %5 = vector.broadcast %4 : vector<16x1xf32> to vector<16x32xf32>
    %6 = arith.subf %0, %5 : vector<16x32xf32>
    %7 = arith.mulf %6, %6 : vector<16x32xf32>
    %cst_2 = arith.constant dense<0.000000e+00> : vector<16xf32>
    %8 = vector.multi_reduction <add>, %7, %cst_2 [1] : vector<16x32xf32> to vector<16xf32>
    %9 = vector.shape_cast %8 : vector<16xf32> to vector<16x1xf32>
    %cst_3 = arith.constant 3.200000e+01 : f32
    %10 = vector.broadcast %cst_3 : f32 to vector<16x1xf32>
    %11 = arith.divf %9, %10 : vector<16x1xf32>
    %cst_4 = arith.constant 9.99999996E-13 : f32
    %12 = vector.broadcast %cst_4 : f32 to vector<16x1xf32>
    %13 = arith.addf %11, %12 : vector<16x1xf32>
    %14 = math.rsqrt %13 : vector<16x1xf32>
    %15 = vector.broadcast %14 : vector<16x1xf32> to vector<16x32xf32>
    %16 = arith.mulf %6, %15 : vector<16x32xf32>
    %c0_5 = arith.constant 0 : index
    %c0_6 = arith.constant 0 : index
    %17 = vector.load %arg2[%c0_5, %c0_6] : memref<1x32xf32, #tpu.memory_space<vmem>>, vector<1x32xf32>
    %18 = vector.broadcast %17 : vector<1x32xf32> to vector<16x32xf32>
    %19 = arith.mulf %16, %18 : vector<16x32xf32>
    %c0_7 = arith.constant 0 : index
    %c0_8 = arith.constant 0 : index
    %20 = vector.load %arg3[%c0_7, %c0_8] : memref<1x32xf32, #tpu.memory_space<vmem>>, vector<1x32xf32>
    %21 = vector.broadcast %20 : vector<1x32xf32> to vector<16x32xf32>
    %22 = arith.addf %19, %21 : vector<16x32xf32>
    %23 = arith.truncf %22 : vector<16x32xf32> to vector<16x32xbf16>
    %c0_9 = arith.constant 0 : index
    %c0_10 = arith.constant 0 : index
    %24 = vector.load %arg4[%c0_9, %c0_10] : memref<16x32xbf16, #tpu.memory_space<vmem>>, vector<16x32xbf16>
    tpu.vector_store %arg4[%c0_9, %c0_10], %23 {strides = array<i32>} : memref<16x32xbf16, #tpu.memory_space<vmem>>, vector<16x32xbf16>,
    return
  }
  func.func @transform_0(%arg0: i32) -> (i32, i32) {
    %c0_i32 = arith.constant 0 : i32
    %c0_i32_0 = arith.constant 0 : i32
    return %arg0, %c0_i32 : i32, i32
  }
  func.func @transform_1(%arg0: i32) -> (i32, i32) {
    %c0_i32 = arith.constant 0 : i32
    %c0_i32_0 = arith.constant 0 : i32
    %c0_i32_1 = arith.constant 0 : i32
    return %c0_i32, %c0_i32_0 : i32, i32
  }
  func.func @transform_2(%arg0: i32) -> (i32, i32) {
    %c0_i32 = arith.constant 0 : i32
    %c0_i32_0 = arith.constant 0 : i32
    %c0_i32_1 = arith.constant 0 : i32
    return %c0_i32, %c0_i32_0 : i32, i32
  }
  func.func @transform_3(%arg0: i32) -> (i32, i32) {
    %c0_i32 = arith.constant 0 : i32
    %c0_i32_0 = arith.constant 0 : i32
    return %arg0, %c0_i32 : i32, i32
  }
}

module attributes {stable_mosaic.version = 11 : i64} {
  func.func @_dense_kernel(%arg0: i32, %arg1: i32, %arg2: i32, %arg3: memref<16x32xbf16, #tpu.memory_space<vmem>>, %arg4: memref<32x96xbf16, #tpu.memory_space<vmem>>, %arg5: memref<1x96xf32, #tpu.memory_space<vmem>>, %arg6: memref<16x96xbf16, #tpu.memory_space<vmem>>, %arg7: memref<16x96xf32, #tpu.memory_space<vmem>>) attributes {dimension_semantics = [#tpu.dimension_semantics<parallel>, #tpu.dimension_semantics<parallel>, #tpu.dimension_semantics<arbitrary>], iteration_bounds = array<i64: 1, 1, 1>, scalar_prefetch = 0 : i64, scratch_operands = 1 : i64, tpu.core_type = #tpu.core_type<tc>, window_params = [{transform_indices = @transform_0, window_bounds = array<i64: 16, 32>}, {transform_indices = @transform_1, window_bounds = array<i64: 32, 96>}, {transform_indices = @transform_2, window_bounds = array<i64: 1, 96>}, {transform_indices = @transform_3, window_bounds = array<i64: 16, 96>}]} {
    %c0_i32 = arith.constant 0 : i32
    %0 = arith.cmpi eq, %arg2, %c0_i32 : i32
    %1 = arith.extui %0 : i1 to i32
    %c0_i32_0 = arith.constant 0 : i32
    %2 = arith.cmpi ne, %1, %c0_i32_0 : i32
    scf.if %2 {
      %cst_10 = arith.constant 0.000000e+00 : f32
      %12 = vector.broadcast %cst_10 : f32 to vector<16x96xf32>
      %c0_11 = arith.constant 0 : index
      %c0_12 = arith.constant 0 : index
      %13 = vector.load %arg7[%c0_11, %c0_12] : memref<16x96xf32, #tpu.memory_space<vmem>>, vector<16x96xf32>
      tpu.vector_store %arg7[%c0_11, %c0_12], %12 {strides = array<i32>} : memref<16x96xf32, #tpu.memory_space<vmem>>, vector<16x96xf32>,
    } else {
    }
    %c0 = arith.constant 0 : index
    %c0_1 = arith.constant 0 : index
    %3 = vector.load %arg7[%c0, %c0_1] : memref<16x96xf32, #tpu.memory_space<vmem>>, vector<16x96xf32>
    %c0_2 = arith.constant 0 : index
    %c0_3 = arith.constant 0 : index
    %4 = vector.load %arg3[%c0_2, %c0_3] : memref<16x32xbf16, #tpu.memory_space<vmem>>, vector<16x32xbf16>
    %c0_4 = arith.constant 0 : index
    %c0_5 = arith.constant 0 : index
    %5 = vector.load %arg4[%c0_4, %c0_5] : memref<32x96xbf16, #tpu.memory_space<vmem>>, vector<32x96xbf16>
    %cst = arith.constant dense<0.000000e+00> : vector<16x96xf32>
    %6 = tpu.matmul %4, %5, %cst {dimension_numbers = #tpu.dot_dimension_numbers<[1], [0], [0], [1], [0, 0, 1, 1], [], []>} : vector<16x32xbf16>, vector<32x96xbf16>, vector<16x96xf32> -> vector<16x96xf32>
    %7 = arith.addf %3, %6 : vector<16x96xf32>
    %c0_6 = arith.constant 0 : index
    %c0_7 = arith.constant 0 : index
    %8 = vector.load %arg7[%c0_6, %c0_7] : memref<16x96xf32, #tpu.memory_space<vmem>>, vector<16x96xf32>
    tpu.vector_store %arg7[%c0_6, %c0_7], %7 {strides = array<i32>} : memref<16x96xf32, #tpu.memory_space<vmem>>, vector<16x96xf32>,
    %c0_i32_8 = arith.constant 0 : i32
    %9 = arith.cmpi eq, %arg2, %c0_i32_8 : i32
    %10 = arith.extui %9 : i1 to i32
    %c0_i32_9 = arith.constant 0 : i32
    %11 = arith.cmpi ne, %10, %c0_i32_9 : i32
    scf.if %11 {
      %c0_10 = arith.constant 0 : index
      %c0_11 = arith.constant 0 : index
      %12 = vector.load %arg7[%c0_10, %c0_11] : memref<16x96xf32, #tpu.memory_space<vmem>>, vector<16x96xf32>
      %c0_12 = arith.constant 0 : index
      %c0_13 = arith.constant 0 : index
      %13 = vector.load %arg5[%c0_12, %c0_13] : memref<1x96xf32, #tpu.memory_space<vmem>>, vector<1x96xf32>
      %14 = vector.broadcast %13 : vector<1x96xf32> to vector<16x96xf32>
      %15 = arith.addf %12, %14 : vector<16x96xf32>
      %16 = arith.truncf %15 : vector<16x96xf32> to vector<16x96xbf16>
      %c0_14 = arith.constant 0 : index
      %c0_15 = arith.constant 0 : index
      %17 = vector.load %arg6[%c0_14, %c0_15] : memref<16x96xbf16, #tpu.memory_space<vmem>>, vector<16x96xbf16>
      tpu.vector_store %arg6[%c0_14, %c0_15], %16 {strides = array<i32>} : memref<16x96xbf16, #tpu.memory_space<vmem>>, vector<16x96xbf16>,
    } else {
    }
    return
  }
  func.func @transform_0(%arg0: i32, %arg1: i32, %arg2: i32) -> (i32, i32) {
    %c0_i32 = arith.constant 0 : i32
    return %arg0, %arg2 : i32, i32
  }
  func.func @transform_1(%arg0: i32, %arg1: i32, %arg2: i32) -> (i32, i32) {
    %c0_i32 = arith.constant 0 : i32
    return %arg2, %arg1 : i32, i32
  }
  func.func @transform_2(%arg0: i32, %arg1: i32, %arg2: i32) -> (i32, i32) {
    %c0_i32 = arith.constant 0 : i32
    %c0_i32_0 = arith.constant 0 : i32
    return %c0_i32, %arg1 : i32, i32
  }
  func.func @transform_3(%arg0: i32, %arg1: i32, %arg2: i32) -> (i32, i32) {
    %c0_i32 = arith.constant 0 : i32
    return %arg0, %arg1 : i32, i32
  }
}

module attributes {stable_mosaic.version = 11 : i64} {
  func.func @_attn_single_kernel(%arg0: i32, %arg1: i32, %arg2: memref<1x2x8x16xbf16, #tpu.memory_space<vmem>>, %arg3: memref<1x2x8x16xbf16, #tpu.memory_space<vmem>>, %arg4: memref<1x2x8x16xbf16, #tpu.memory_space<vmem>>, %arg5: memref<1x1x8xf32, #tpu.memory_space<vmem>>, %arg6: memref<1x8x32xbf16, #tpu.memory_space<vmem>>) attributes {dimension_semantics = [#tpu.dimension_semantics<parallel>, #tpu.dimension_semantics<parallel>], iteration_bounds = array<i64: 2, 1>, scalar_prefetch = 0 : i64, scratch_operands = 0 : i64, tpu.core_type = #tpu.core_type<tc>, window_params = [{transform_indices = @transform_0, window_bounds = array<i64: 1, 2, 8, 16>}, {transform_indices = @transform_1, window_bounds = array<i64: 1, 2, 8, 16>}, {transform_indices = @transform_2, window_bounds = array<i64: 1, 2, 8, 16>}, {transform_indices = @transform_3, window_bounds = array<i64: 1, 1, 8>}, {transform_indices = @transform_4, window_bounds = array<i64: 1, 8, 32>}]} {
    %c0 = arith.constant 0 : index
    %c0_0 = arith.constant 0 : index
    %c0_1 = arith.constant 0 : index
    %c0_2 = arith.constant 0 : index
    %0 = vector.load %arg2[%c0, %c0_0, %c0_1, %c0_2] : memref<1x2x8x16xbf16, #tpu.memory_space<vmem>>, vector<1x2x8x16xbf16>
    %1 = vector.shape_cast %0 : vector<1x2x8x16xbf16> to vector<2x8x16xbf16>
    %cst = arith.constant 2.500000e-01 : bf16
    %2 = vector.broadcast %cst : bf16 to vector<2x8x16xbf16>
    %3 = arith.mulf %1, %2 : vector<2x8x16xbf16>
    %c0_3 = arith.constant 0 : index
    %c0_4 = arith.constant 0 : index
    %c0_5 = arith.constant 0 : index
    %c0_6 = arith.constant 0 : index
    %4 = vector.load %arg3[%c0_3, %c0_4, %c0_5, %c0_6] : memref<1x2x8x16xbf16, #tpu.memory_space<vmem>>, vector<1x2x8x16xbf16>
    %5 = vector.shape_cast %4 : vector<1x2x8x16xbf16> to vector<2x8x16xbf16>
    %c0_7 = arith.constant 0 : index
    %c0_8 = arith.constant 0 : index
    %c0_9 = arith.constant 0 : index
    %c0_10 = arith.constant 0 : index
    %6 = vector.load %arg4[%c0_7, %c0_8, %c0_9, %c0_10] : memref<1x2x8x16xbf16, #tpu.memory_space<vmem>>, vector<1x2x8x16xbf16>
    %7 = vector.shape_cast %6 : vector<1x2x8x16xbf16> to vector<2x8x16xbf16>
    "tpu.trace_start"() <{level = 10 : i32, message = "hqd,hkd->hqk"}> : () -> ()
    %cst_11 = arith.constant dense<0.000000e+00> : vector<2x8x8xf32>
    %8 = tpu.matmul %3, %5, %cst_11 {dimension_numbers = #tpu.dot_dimension_numbers<[2], [2], [1], [1], [0, 0, 0, 1, 1, 1], [0], [0]>} : vector<2x8x16xbf16>, vector<2x8x16xbf16>, vector<2x8x8xf32> -> vector<2x8x8xf32>
    "tpu.trace_stop"() : () -> ()
    %c0_12 = arith.constant 0 : index
    %c0_13 = arith.constant 0 : index
    %c0_14 = arith.constant 0 : index
    %9 = vector.load %arg5[%c0_12, %c0_13, %c0_14] : memref<1x1x8xf32, #tpu.memory_space<vmem>>, vector<1x1x8xf32>
    %10 = vector.shape_cast %9 : vector<1x1x8xf32> to vector<1x8xf32>
    %11 = vector.shape_cast %10 : vector<1x8xf32> to vector<1x1x8xf32>
    %12 = vector.broadcast %11 : vector<1x1x8xf32> to vector<2x8x8xf32>
    %13 = arith.addf %8, %12 : vector<2x8x8xf32>
    %cst_15 = arith.constant dense<0xFF800000> : vector<2x8xf32>
    %14 = vector.multi_reduction <maximumf>, %13, %cst_15 [2] : vector<2x8x8xf32> to vector<2x8xf32>
    %15 = vector.shape_cast %14 : vector<2x8xf32> to vector<2x8x1xf32>
    %16 = vector.broadcast %15 : vector<2x8x1xf32> to vector<2x8x8xf32>
    %17 = arith.subf %13, %16 : vector<2x8x8xf32>
    %18 = math.exp %17 : vector<2x8x8xf32>
    %cst_16 = arith.constant dense<0.000000e+00> : vector<2x8xf32>
    %19 = vector.multi_reduction <add>, %18, %cst_16 [2] : vector<2x8x8xf32> to vector<2x8xf32>
    %20 = vector.shape_cast %19 : vector<2x8xf32> to vector<2x8x1xf32>
    %21 = arith.truncf %18 : vector<2x8x8xf32> to vector<2x8x8xbf16>
    "tpu.trace_start"() <{level = 10 : i32, message = "hqk,hkd->hqd"}> : () -> ()
    %cst_17 = arith.constant dense<0.000000e+00> : vector<2x8x16xf32>
    %22 = tpu.matmul %21, %7, %cst_17 {dimension_numbers = #tpu.dot_dimension_numbers<[2], [1], [1], [2], [0, 0, 0, 1, 1, 2], [0], [0]>} : vector<2x8x8xbf16>, vector<2x8x16xbf16>, vector<2x8x16xf32> -> vector<2x8x16xf32>
    "tpu.trace_stop"() : () -> ()
    %23 = tpu.reciprocal %20 {approx = true} : vector<2x8x1xf32> -> vector<2x8x1xf32>
    %24 = vector.broadcast %23 : vector<2x8x1xf32> to vector<2x8x16xf32>
    %25 = arith.mulf %22, %24 : vector<2x8x16xf32>
    %26 = vector.extract_strided_slice %25 {offsets = [0, 0, 0], sizes = [1, 8, 16], strides = [1, 1, 1]} : vector<2x8x16xf32> to vector<1x8x16xf32>
    %27 = vector.shape_cast %26 : vector<1x8x16xf32> to vector<8x16xf32>
    %28 = arith.truncf %27 : vector<8x16xf32> to vector<8x16xbf16>
    %c0_18 = arith.constant 0 : index
    %c0_19 = arith.constant 0 : index
    %c0_20 = arith.constant 0 : index
    %29 = vector.load %arg6[%c0_18, %c0_19, %c0_20] : memref<1x8x32xbf16, #tpu.memory_space<vmem>>, vector<1x8x16xbf16>
    %30 = vector.shape_cast %29 : vector<1x8x16xbf16> to vector<8x16xbf16>
    %31 = vector.shape_cast %28 : vector<8x16xbf16> to vector<1x8x16xbf16>
    tpu.vector_store %arg6[%c0_18, %c0_19, %c0_20], %31 {strides = array<i32>} : memref<1x8x32xbf16, #tpu.memory_space<vmem>>, vector<1x8x16xbf16>,
    %32 = vector.extract_strided_slice %25 {offsets = [1, 0, 0], sizes = [1, 8, 16], strides = [1, 1, 1]} : vector<2x8x16xf32> to vector<1x8x16xf32>
    %33 = vector.shape_cast %32 : vector<1x8x16xf32> to vector<8x16xf32>
    %34 = arith.truncf %33 : vector<8x16xf32> to vector<8x16xbf16>
    %c0_21 = arith.constant 0 : index
    %c0_22 = arith.constant 0 : index
    %c16 = arith.constant 16 : index
    %35 = vector.load %arg6[%c0_21, %c0_22, %c16] : memref<1x8x32xbf16, #tpu.memory_space<vmem>>, vector<1x8x16xbf16>
    %36 = vector.shape_cast %35 : vector<1x8x16xbf16> to vector<8x16xbf16>
    %37 = vector.shape_cast %34 : vector<8x16xbf16> to vector<1x8x16xbf16>
    tpu.vector_store %arg6[%c0_21, %c0_22, %c16], %37 {strides = array<i32>} : memref<1x8x32xbf16, #tpu.memory_space<vmem>>, vector<1x8x16xbf16>,
    return
  }
  func.func @transform_0(%arg0: i32, %arg1: i32) -> (i32, i32, i32, i32) {
    %c0_i32 = arith.constant 0 : i32
    %c0_i32_0 = arith.constant 0 : i32
    %c0_i32_1 = arith.constant 0 : i32
    return %arg0, %c0_i32, %arg1, %c0_i32_0 : i32, i32, i32, i32
  }
  func.func @transform_1(%arg0: i32, %arg1: i32) -> (i32, i32, i32, i32) {
    %c0_i32 = arith.constant 0 : i32
    %c0_i32_0 = arith.constant 0 : i32
    %c0_i32_1 = arith.constant 0 : i32
    %c0_i32_2 = arith.constant 0 : i32
    return %arg0, %c0_i32, %c0_i32_0, %c0_i32_1 : i32, i32, i32, i32
  }
  func.func @transform_2(%arg0: i32, %arg1: i32) -> (i32, i32, i32, i32) {
    %c0_i32 = arith.constant 0 : i32
    %c0_i32_0 = arith.constant 0 : i32
    %c0_i32_1 = arith.constant 0 : i32
    %c0_i32_2 = arith.constant 0 : i32
    return %arg0, %c0_i32, %c0_i32_0, %c0_i32_1 : i32, i32, i32, i32
  }
  func.func @transform_3(%arg0: i32, %arg1: i32) -> (i32, i32, i32) {
    %c0_i32 = arith.constant 0 : i32
    %c0_i32_0 = arith.constant 0 : i32
    %c0_i32_1 = arith.constant 0 : i32
    return %arg0, %c0_i32, %c0_i32_0 : i32, i32, i32
  }
  func.func @transform_4(%arg0: i32, %arg1: i32) -> (i32, i32, i32) {
    %c0_i32 = arith.constant 0 : i32
    %c0_i32_0 = arith.constant 0 : i32
    return %arg0, %arg1, %c0_i32 : i32, i32, i32
  }
}

module attributes {stable_mosaic.version = 11 : i64} {
  func.func @_dense_res_ln_kernel(%arg0: i32, %arg1: i32, %arg2: memref<16x32xbf16, #tpu.memory_space<vmem>>, %arg3: memref<32x32xbf16, #tpu.memory_space<vmem>>, %arg4: memref<1x32xf32, #tpu.memory_space<vmem>>, %arg5: memref<16x32xbf16, #tpu.memory_space<vmem>>, %arg6: memref<1x32xf32, #tpu.memory_space<vmem>>, %arg7: memref<1x32xf32, #tpu.memory_space<vmem>>, %arg8: memref<16x32xbf16, #tpu.memory_space<vmem>>, %arg9: memref<16x32xf32, #tpu.memory_space<vmem>>) attributes {dimension_semantics = [#tpu.dimension_semantics<parallel>, #tpu.dimension_semantics<arbitrary>], iteration_bounds = array<i64: 1, 1>, scalar_prefetch = 0 : i64, scratch_operands = 1 : i64, tpu.core_type = #tpu.core_type<tc>, window_params = [{transform_indices = @transform_0, window_bounds = array<i64: 16, 32>}, {transform_indices = @transform_1, window_bounds = array<i64: 32, 32>}, {pipeline_mode = #tpu.pipeline_mode<synchronous>, transform_indices = @transform_2, window_bounds = array<i64: 1, 32>}, {transform_indices = @transform_3, window_bounds = array<i64: 16, 32>}, {pipeline_mode = #tpu.pipeline_mode<synchronous>, transform_indices = @transform_4, window_bounds = array<i64: 1, 32>}, {pipeline_mode = #tpu.pipeline_mode<synchronous>, transform_indices = @transform_5, window_bounds = array<i64: 1, 32>}, {transform_indices = @transform_6, window_bounds = array<i64: 16, 32>}]} {
    %c0_i32 = arith.constant 0 : i32
    %0 = arith.cmpi eq, %arg1, %c0_i32 : i32
    %1 = arith.extui %0 : i1 to i32
    %c0_i32_0 = arith.constant 0 : i32
    %2 = arith.cmpi ne, %1, %c0_i32_0 : i32
    scf.if %2 {
      %cst_10 = arith.constant 0.000000e+00 : f32
      %12 = vector.broadcast %cst_10 : f32 to vector<16x32xf32>
      %c0_11 = arith.constant 0 : index
      %c0_12 = arith.constant 0 : index
      %13 = vector.load %arg9[%c0_11, %c0_12] : memref<16x32xf32, #tpu.memory_space<vmem>>, vector<16x32xf32>
      tpu.vector_store %arg9[%c0_11, %c0_12], %12 {strides = array<i32>} : memref<16x32xf32, #tpu.memory_space<vmem>>, vector<16x32xf32>,
    } else {
    }
    %c0 = arith.constant 0 : index
    %c0_1 = arith.constant 0 : index
    %3 = vector.load %arg9[%c0, %c0_1] : memref<16x32xf32, #tpu.memory_space<vmem>>, vector<16x32xf32>
    %c0_2 = arith.constant 0 : index
    %c0_3 = arith.constant 0 : index
    %4 = vector.load %arg2[%c0_2, %c0_3] : memref<16x32xbf16, #tpu.memory_space<vmem>>, vector<16x32xbf16>
    %c0_4 = arith.constant 0 : index
    %c0_5 = arith.constant 0 : index
    %5 = vector.load %arg3[%c0_4, %c0_5] : memref<32x32xbf16, #tpu.memory_space<vmem>>, vector<32x32xbf16>
    %cst = arith.constant dense<0.000000e+00> : vector<16x32xf32>
    %6 = tpu.matmul %4, %5, %cst {dimension_numbers = #tpu.dot_dimension_numbers<[1], [0], [0], [1], [0, 0, 1, 1], [], []>} : vector<16x32xbf16>, vector<32x32xbf16>, vector<16x32xf32> -> vector<16x32xf32>
    %7 = arith.addf %3, %6 : vector<16x32xf32>
    %c0_6 = arith.constant 0 : index
    %c0_7 = arith.constant 0 : index
    %8 = vector.load %arg9[%c0_6, %c0_7] : memref<16x32xf32, #tpu.memory_space<vmem>>, vector<16x32xf32>
    tpu.vector_store %arg9[%c0_6, %c0_7], %7 {strides = array<i32>} : memref<16x32xf32, #tpu.memory_space<vmem>>, vector<16x32xf32>,
    %c0_i32_8 = arith.constant 0 : i32
    %9 = arith.cmpi eq, %arg1, %c0_i32_8 : i32
    %10 = arith.extui %9 : i1 to i32
    %c0_i32_9 = arith.constant 0 : i32
    %11 = arith.cmpi ne, %10, %c0_i32_9 : i32
    scf.if %11 {
      %c0_10 = arith.constant 0 : index
      %c0_11 = arith.constant 0 : index
      %12 = vector.load %arg9[%c0_10, %c0_11] : memref<16x32xf32, #tpu.memory_space<vmem>>, vector<16x32xf32>
      %c0_12 = arith.constant 0 : index
      %c0_13 = arith.constant 0 : index
      %13 = vector.load %arg4[%c0_12, %c0_13] : memref<1x32xf32, #tpu.memory_space<vmem>>, vector<1x32xf32>
      %14 = vector.broadcast %13 : vector<1x32xf32> to vector<16x32xf32>
      %15 = arith.addf %12, %14 : vector<16x32xf32>
      %c0_14 = arith.constant 0 : index
      %c0_15 = arith.constant 0 : index
      %16 = vector.load %arg5[%c0_14, %c0_15] : memref<16x32xbf16, #tpu.memory_space<vmem>>, vector<16x32xbf16>
      %17 = arith.extf %16 : vector<16x32xbf16> to vector<16x32xf32>
      %18 = arith.addf %15, %17 : vector<16x32xf32>
      %cst_16 = arith.constant dense<0.000000e+00> : vector<16xf32>
      %19 = vector.multi_reduction <add>, %18, %cst_16 [1] : vector<16x32xf32> to vector<16xf32>
      %20 = vector.shape_cast %19 : vector<16xf32> to vector<16x1xf32>
      %cst_17 = arith.constant 3.200000e+01 : f32
      %21 = vector.broadcast %cst_17 : f32 to vector<16x1xf32>
      %22 = arith.divf %20, %21 : vector<16x1xf32>
      %23 = vector.broadcast %22 : vector<16x1xf32> to vector<16x32xf32>
      %24 = arith.subf %18, %23 : vector<16x32xf32>
      %25 = arith.mulf %24, %24 : vector<16x32xf32>
      %cst_18 = arith.constant dense<0.000000e+00> : vector<16xf32>
      %26 = vector.multi_reduction <add>, %25, %cst_18 [1] : vector<16x32xf32> to vector<16xf32>
      %27 = vector.shape_cast %26 : vector<16xf32> to vector<16x1xf32>
      %cst_19 = arith.constant 3.200000e+01 : f32
      %28 = vector.broadcast %cst_19 : f32 to vector<16x1xf32>
      %29 = arith.divf %27, %28 : vector<16x1xf32>
      %cst_20 = arith.constant 9.99999996E-13 : f32
      %30 = vector.broadcast %cst_20 : f32 to vector<16x1xf32>
      %31 = arith.addf %29, %30 : vector<16x1xf32>
      %32 = math.rsqrt %31 : vector<16x1xf32>
      %33 = vector.broadcast %32 : vector<16x1xf32> to vector<16x32xf32>
      %34 = arith.mulf %24, %33 : vector<16x32xf32>
      %c0_21 = arith.constant 0 : index
      %c0_22 = arith.constant 0 : index
      %35 = vector.load %arg6[%c0_21, %c0_22] : memref<1x32xf32, #tpu.memory_space<vmem>>, vector<1x32xf32>
      %36 = vector.broadcast %35 : vector<1x32xf32> to vector<16x32xf32>
      %37 = arith.mulf %34, %36 : vector<16x32xf32>
      %c0_23 = arith.constant 0 : index
      %c0_24 = arith.constant 0 : index
      %38 = vector.load %arg7[%c0_23, %c0_24] : memref<1x32xf32, #tpu.memory_space<vmem>>, vector<1x32xf32>
      %39 = vector.broadcast %38 : vector<1x32xf32> to vector<16x32xf32>
      %40 = arith.addf %37, %39 : vector<16x32xf32>
      %41 = arith.truncf %40 : vector<16x32xf32> to vector<16x32xbf16>
      %c0_25 = arith.constant 0 : index
      %c0_26 = arith.constant 0 : index
      %42 = vector.load %arg8[%c0_25, %c0_26] : memref<16x32xbf16, #tpu.memory_space<vmem>>, vector<16x32xbf16>
      tpu.vector_store %arg8[%c0_25, %c0_26], %41 {strides = array<i32>} : memref<16x32xbf16, #tpu.memory_space<vmem>>, vector<16x32xbf16>,
    } else {
    }
    return
  }
  func.func @transform_0(%arg0: i32, %arg1: i32) -> (i32, i32) {
    %c0_i32 = arith.constant 0 : i32
    return %arg0, %arg1 : i32, i32
  }
  func.func @transform_1(%arg0: i32, %arg1: i32) -> (i32, i32) {
    %c0_i32 = arith.constant 0 : i32
    %c0_i32_0 = arith.constant 0 : i32
    return %arg1, %c0_i32 : i32, i32
  }
  func.func @transform_2(%arg0: i32, %arg1: i32) -> (i32, i32) {
    %c0_i32 = arith.constant 0 : i32
    %c0_i32_0 = arith.constant 0 : i32
    %c0_i32_1 = arith.constant 0 : i32
    return %c0_i32, %c0_i32_0 : i32, i32
  }
  func.func @transform_3(%arg0: i32, %arg1: i32) -> (i32, i32) {
    %c0_i32 = arith.constant 0 : i32
    %c0_i32_0 = arith.constant 0 : i32
    return %arg0, %c0_i32 : i32, i32
  }
  func.func @transform_4(%arg0: i32, %arg1: i32) -> (i32, i32) {
    %c0_i32 = arith.constant 0 : i32
    %c0_i32_0 = arith.constant 0 : i32
    %c0_i32_1 = arith.constant 0 : i32
    return %c0_i32, %c0_i32_0 : i32, i32
  }
  func.func @transform_5(%arg0: i32, %arg1: i32) -> (i32, i32) {
    %c0_i32 = arith.constant 0 : i32
    %c0_i32_0 = arith.constant 0 : i32
    %c0_i32_1 = arith.constant 0 : i32
    return %c0_i32, %c0_i32_0 : i32, i32
  }
  func.func @transform_6(%arg0: i32, %arg1: i32) -> (i32, i32) {
    %c0_i32 = arith.constant 0 : i32
    %c0_i32_0 = arith.constant 0 : i32
    return %arg0, %c0_i32 : i32, i32
  }
}

module attributes {stable_mosaic.version = 11 : i64} {
  func.func @_dense_kernel(%arg0: i32, %arg1: i32, %arg2: i32, %arg3: memref<16x32xbf16, #tpu.memory_space<vmem>>, %arg4: memref<32x128xbf16, #tpu.memory_space<vmem>>, %arg5: memref<1x128xf32, #tpu.memory_space<vmem>>, %arg6: memref<16x128xbf16, #tpu.memory_space<vmem>>, %arg7: memref<16x128xf32, #tpu.memory_space<vmem>>) attributes {dimension_semantics = [#tpu.dimension_semantics<parallel>, #tpu.dimension_semantics<parallel>, #tpu.dimension_semantics<arbitrary>], iteration_bounds = array<i64: 1, 1, 1>, scalar_prefetch = 0 : i64, scratch_operands = 1 : i64, tpu.core_type = #tpu.core_type<tc>, window_params = [{transform_indices = @transform_0, window_bounds = array<i64: 16, 32>}, {transform_indices = @transform_1, window_bounds = array<i64: 32, 128>}, {transform_indices = @transform_2, window_bounds = array<i64: 1, 128>}, {transform_indices = @transform_3, window_bounds = array<i64: 16, 128>}]} {
    %c0_i32 = arith.constant 0 : i32
    %0 = arith.cmpi eq, %arg2, %c0_i32 : i32
    %1 = arith.extui %0 : i1 to i32
    %c0_i32_0 = arith.constant 0 : i32
    %2 = arith.cmpi ne, %1, %c0_i32_0 : i32
    scf.if %2 {
      %cst_10 = arith.constant 0.000000e+00 : f32
      %12 = vector.broadcast %cst_10 : f32 to vector<16x128xf32>
      %c0_11 = arith.constant 0 : index
      %c0_12 = arith.constant 0 : index
      %13 = vector.load %arg7[%c0_11, %c0_12] : memref<16x128xf32, #tpu.memory_space<vmem>>, vector<16x128xf32>
      tpu.vector_store %arg7[%c0_11, %c0_12], %12 {strides = array<i32>} : memref<16x128xf32, #tpu.memory_space<vmem>>, vector<16x128xf32>,
    } else {
    }
    %c0 = arith.constant 0 : index
    %c0_1 = arith.constant 0 : index
    %3 = vector.load %arg7[%c0, %c0_1] : memref<16x128xf32, #tpu.memory_space<vmem>>, vector<16x128xf32>
    %c0_2 = arith.constant 0 : index
    %c0_3 = arith.constant 0 : index
    %4 = vector.load %arg3[%c0_2, %c0_3] : memref<16x32xbf16, #tpu.memory_space<vmem>>, vector<16x32xbf16>
    %c0_4 = arith.constant 0 : index
    %c0_5 = arith.constant 0 : index
    %5 = vector.load %arg4[%c0_4, %c0_5] : memref<32x128xbf16, #tpu.memory_space<vmem>>, vector<32x128xbf16>
    %cst = arith.constant dense<0.000000e+00> : vector<16x128xf32>
    %6 = tpu.matmul %4, %5, %cst {dimension_numbers = #tpu.dot_dimension_numbers<[1], [0], [0], [1], [0, 0, 1, 1], [], []>} : vector<16x32xbf16>, vector<32x128xbf16>, vector<16x128xf32> -> vector<16x128xf32>
    %7 = arith.addf %3, %6 : vector<16x128xf32>
    %c0_6 = arith.constant 0 : index
    %c0_7 = arith.constant 0 : index
    %8 = vector.load %arg7[%c0_6, %c0_7] : memref<16x128xf32, #tpu.memory_space<vmem>>, vector<16x128xf32>
    tpu.vector_store %arg7[%c0_6, %c0_7], %7 {strides = array<i32>} : memref<16x128xf32, #tpu.memory_space<vmem>>, vector<16x128xf32>,
    %c0_i32_8 = arith.constant 0 : i32
    %9 = arith.cmpi eq, %arg2, %c0_i32_8 : i32
    %10 = arith.extui %9 : i1 to i32
    %c0_i32_9 = arith.constant 0 : i32
    %11 = arith.cmpi ne, %10, %c0_i32_9 : i32
    scf.if %11 {
      %c0_10 = arith.constant 0 : index
      %c0_11 = arith.constant 0 : index
      %12 = vector.load %arg7[%c0_10, %c0_11] : memref<16x128xf32, #tpu.memory_space<vmem>>, vector<16x128xf32>
      %c0_12 = arith.constant 0 : index
      %c0_13 = arith.constant 0 : index
      %13 = vector.load %arg5[%c0_12, %c0_13] : memref<1x128xf32, #tpu.memory_space<vmem>>, vector<1x128xf32>
      %14 = vector.broadcast %13 : vector<1x128xf32> to vector<16x128xf32>
      %15 = arith.addf %12, %14 : vector<16x128xf32>
      %cst_14 = arith.constant 5.000000e-01 : f32
      %16 = vector.broadcast %cst_14 : f32 to vector<16x128xf32>
      %17 = arith.mulf %16, %15 : vector<16x128xf32>
      %cst_15 = arith.constant 4.471500e-02 : f32
      %18 = vector.broadcast %cst_15 : f32 to vector<16x128xf32>
      %19 = arith.mulf %18, %15 : vector<16x128xf32>
      %20 = arith.mulf %19, %15 : vector<16x128xf32>
      %21 = arith.mulf %20, %15 : vector<16x128xf32>
      %22 = arith.addf %15, %21 : vector<16x128xf32>
      %cst_16 = arith.constant 0.797884583 : f32
      %23 = vector.broadcast %cst_16 : f32 to vector<16x128xf32>
      %24 = arith.mulf %23, %22 : vector<16x128xf32>
      %25 = math.tanh %24 : vector<16x128xf32>
      %cst_17 = arith.constant 1.000000e+00 : f32
      %26 = vector.broadcast %cst_17 : f32 to vector<16x128xf32>
      %27 = arith.addf %26, %25 : vector<16x128xf32>
      %28 = arith.mulf %17, %27 : vector<16x128xf32>
      %29 = arith.truncf %28 : vector<16x128xf32> to vector<16x128xbf16>
      %c0_18 = arith.constant 0 : index
      %c0_19 = arith.constant 0 : index
      %30 = vector.load %arg6[%c0_18, %c0_19] : memref<16x128xbf16, #tpu.memory_space<vmem>>, vector<16x128xbf16>
      tpu.vector_store %arg6[%c0_18, %c0_19], %29 {strides = array<i32>} : memref<16x128xbf16, #tpu.memory_space<vmem>>, vector<16x128xbf16>,
    } else {
    }
    return
  }
  func.func @transform_0(%arg0: i32, %arg1: i32, %arg2: i32) -> (i32, i32) {
    %c0_i32 = arith.constant 0 : i32
    return %arg0, %arg2 : i32, i32
  }
  func.func @transform_1(%arg0: i32, %arg1: i32, %arg2: i32) -> (i32, i32) {
    %c0_i32 = arith.constant 0 : i32
    return %arg2, %arg1 : i32, i32
  }
  func.func @transform_2(%arg0: i32, %arg1: i32, %arg2: i32) -> (i32, i32) {
    %c0_i32 = arith.constant 0 : i32
    %c0_i32_0 = arith.constant 0 : i32
    return %c0_i32, %arg1 : i32, i32
  }
  func.func @transform_3(%arg0: i32, %arg1: i32, %arg2: i32) -> (i32, i32) {
    %c0_i32 = arith.constant 0 : i32
    return %arg0, %arg1 : i32, i32
  }
}

module attributes {stable_mosaic.version = 11 : i64} {
  func.func @_dense_res_ln_kernel(%arg0: i32, %arg1: i32, %arg2: memref<16x128xbf16, #tpu.memory_space<vmem>>, %arg3: memref<128x32xbf16, #tpu.memory_space<vmem>>, %arg4: memref<1x32xf32, #tpu.memory_space<vmem>>, %arg5: memref<16x32xbf16, #tpu.memory_space<vmem>>, %arg6: memref<1x32xf32, #tpu.memory_space<vmem>>, %arg7: memref<1x32xf32, #tpu.memory_space<vmem>>, %arg8: memref<16x32xbf16, #tpu.memory_space<vmem>>, %arg9: memref<16x32xf32, #tpu.memory_space<vmem>>) attributes {dimension_semantics = [#tpu.dimension_semantics<parallel>, #tpu.dimension_semantics<arbitrary>], iteration_bounds = array<i64: 1, 1>, scalar_prefetch = 0 : i64, scratch_operands = 1 : i64, tpu.core_type = #tpu.core_type<tc>, window_params = [{transform_indices = @transform_0, window_bounds = array<i64: 16, 128>}, {transform_indices = @transform_1, window_bounds = array<i64: 128, 32>}, {pipeline_mode = #tpu.pipeline_mode<synchronous>, transform_indices = @transform_2, window_bounds = array<i64: 1, 32>}, {transform_indices = @transform_3, window_bounds = array<i64: 16, 32>}, {pipeline_mode = #tpu.pipeline_mode<synchronous>, transform_indices = @transform_4, window_bounds = array<i64: 1, 32>}, {pipeline_mode = #tpu.pipeline_mode<synchronous>, transform_indices = @transform_5, window_bounds = array<i64: 1, 32>}, {transform_indices = @transform_6, window_bounds = array<i64: 16, 32>}]} {
    %c0_i32 = arith.constant 0 : i32
    %0 = arith.cmpi eq, %arg1, %c0_i32 : i32
    %1 = arith.extui %0 : i1 to i32
    %c0_i32_0 = arith.constant 0 : i32
    %2 = arith.cmpi ne, %1, %c0_i32_0 : i32
    scf.if %2 {
      %cst_10 = arith.constant 0.000000e+00 : f32
      %12 = vector.broadcast %cst_10 : f32 to vector<16x32xf32>
      %c0_11 = arith.constant 0 : index
      %c0_12 = arith.constant 0 : index
      %13 = vector.load %arg9[%c0_11, %c0_12] : memref<16x32xf32, #tpu.memory_space<vmem>>, vector<16x32xf32>
      tpu.vector_store %arg9[%c0_11, %c0_12], %12 {strides = array<i32>} : memref<16x32xf32, #tpu.memory_space<vmem>>, vector<16x32xf32>,
    } else {
    }
    %c0 = arith.constant 0 : index
    %c0_1 = arith.constant 0 : index
    %3 = vector.load %arg9[%c0, %c0_1] : memref<16x32xf32, #tpu.memory_space<vmem>>, vector<16x32xf32>
    %c0_2 = arith.constant 0 : index
    %c0_3 = arith.constant 0 : index
    %4 = vector.load %arg2[%c0_2, %c0_3] : memref<16x128xbf16, #tpu.memory_space<vmem>>, vector<16x128xbf16>
    %c0_4 = arith.constant 0 : index
    %c0_5 = arith.constant 0 : index
    %5 = vector.load %arg3[%c0_4, %c0_5] : memref<128x32xbf16, #tpu.memory_space<vmem>>, vector<128x32xbf16>
    %cst = arith.constant dense<0.000000e+00> : vector<16x32xf32>
    %6 = tpu.matmul %4, %5, %cst {dimension_numbers = #tpu.dot_dimension_numbers<[1], [0], [0], [1], [0, 0, 1, 1], [], []>} : vector<16x128xbf16>, vector<128x32xbf16>, vector<16x32xf32> -> vector<16x32xf32>
    %7 = arith.addf %3, %6 : vector<16x32xf32>
    %c0_6 = arith.constant 0 : index
    %c0_7 = arith.constant 0 : index
    %8 = vector.load %arg9[%c0_6, %c0_7] : memref<16x32xf32, #tpu.memory_space<vmem>>, vector<16x32xf32>
    tpu.vector_store %arg9[%c0_6, %c0_7], %7 {strides = array<i32>} : memref<16x32xf32, #tpu.memory_space<vmem>>, vector<16x32xf32>,
    %c0_i32_8 = arith.constant 0 : i32
    %9 = arith.cmpi eq, %arg1, %c0_i32_8 : i32
    %10 = arith.extui %9 : i1 to i32
    %c0_i32_9 = arith.constant 0 : i32
    %11 = arith.cmpi ne, %10, %c0_i32_9 : i32
    scf.if %11 {
      %c0_10 = arith.constant 0 : index
      %c0_11 = arith.constant 0 : index
      %12 = vector.load %arg9[%c0_10, %c0_11] : memref<16x32xf32, #tpu.memory_space<vmem>>, vector<16x32xf32>
      %c0_12 = arith.constant 0 : index
      %c0_13 = arith.constant 0 : index
      %13 = vector.load %arg4[%c0_12, %c0_13] : memref<1x32xf32, #tpu.memory_space<vmem>>, vector<1x32xf32>
      %14 = vector.broadcast %13 : vector<1x32xf32> to vector<16x32xf32>
      %15 = arith.addf %12, %14 : vector<16x32xf32>
      %c0_14 = arith.constant 0 : index
      %c0_15 = arith.constant 0 : index
      %16 = vector.load %arg5[%c0_14, %c0_15] : memref<16x32xbf16, #tpu.memory_space<vmem>>, vector<16x32xbf16>
      %17 = arith.extf %16 : vector<16x32xbf16> to vector<16x32xf32>
      %18 = arith.addf %15, %17 : vector<16x32xf32>
      %cst_16 = arith.constant dense<0.000000e+00> : vector<16xf32>
      %19 = vector.multi_reduction <add>, %18, %cst_16 [1] : vector<16x32xf32> to vector<16xf32>
      %20 = vector.shape_cast %19 : vector<16xf32> to vector<16x1xf32>
      %cst_17 = arith.constant 3.200000e+01 : f32
      %21 = vector.broadcast %cst_17 : f32 to vector<16x1xf32>
      %22 = arith.divf %20, %21 : vector<16x1xf32>
      %23 = vector.broadcast %22 : vector<16x1xf32> to vector<16x32xf32>
      %24 = arith.subf %18, %23 : vector<16x32xf32>
      %25 = arith.mulf %24, %24 : vector<16x32xf32>
      %cst_18 = arith.constant dense<0.000000e+00> : vector<16xf32>
      %26 = vector.multi_reduction <add>, %25, %cst_18 [1] : vector<16x32xf32> to vector<16xf32>
      %27 = vector.shape_cast %26 : vector<16xf32> to vector<16x1xf32>
      %cst_19 = arith.constant 3.200000e+01 : f32
      %28 = vector.broadcast %cst_19 : f32 to vector<16x1xf32>
      %29 = arith.divf %27, %28 : vector<16x1xf32>
      %cst_20 = arith.constant 9.99999996E-13 : f32
      %30 = vector.broadcast %cst_20 : f32 to vector<16x1xf32>
      %31 = arith.addf %29, %30 : vector<16x1xf32>
      %32 = math.rsqrt %31 : vector<16x1xf32>
      %33 = vector.broadcast %32 : vector<16x1xf32> to vector<16x32xf32>
      %34 = arith.mulf %24, %33 : vector<16x32xf32>
      %c0_21 = arith.constant 0 : index
      %c0_22 = arith.constant 0 : index
      %35 = vector.load %arg6[%c0_21, %c0_22] : memref<1x32xf32, #tpu.memory_space<vmem>>, vector<1x32xf32>
      %36 = vector.broadcast %35 : vector<1x32xf32> to vector<16x32xf32>
      %37 = arith.mulf %34, %36 : vector<16x32xf32>
      %c0_23 = arith.constant 0 : index
      %c0_24 = arith.constant 0 : index
      %38 = vector.load %arg7[%c0_23, %c0_24] : memref<1x32xf32, #tpu.memory_space<vmem>>, vector<1x32xf32>
      %39 = vector.broadcast %38 : vector<1x32xf32> to vector<16x32xf32>
      %40 = arith.addf %37, %39 : vector<16x32xf32>
      %41 = arith.truncf %40 : vector<16x32xf32> to vector<16x32xbf16>
      %c0_25 = arith.constant 0 : index
      %c0_26 = arith.constant 0 : index
      %42 = vector.load %arg8[%c0_25, %c0_26] : memref<16x32xbf16, #tpu.memory_space<vmem>>, vector<16x32xbf16>
      tpu.vector_store %arg8[%c0_25, %c0_26], %41 {strides = array<i32>} : memref<16x32xbf16, #tpu.memory_space<vmem>>, vector<16x32xbf16>,
    } else {
    }
    return
  }
  func.func @transform_0(%arg0: i32, %arg1: i32) -> (i32, i32) {
    %c0_i32 = arith.constant 0 : i32
    return %arg0, %arg1 : i32, i32
  }
  func.func @transform_1(%arg0: i32, %arg1: i32) -> (i32, i32) {
    %c0_i32 = arith.constant 0 : i32
    %c0_i32_0 = arith.constant 0 : i32
    return %arg1, %c0_i32 : i32, i32
  }
  func.func @transform_2(%arg0: i32, %arg1: i32) -> (i32, i32) {
    %c0_i32 = arith.constant 0 : i32
    %c0_i32_0 = arith.constant 0 : i32
    %c0_i32_1 = arith.constant 0 : i32
    return %c0_i32, %c0_i32_0 : i32, i32
  }
  func.func @transform_3(%arg0: i32, %arg1: i32) -> (i32, i32) {
    %c0_i32 = arith.constant 0 : i32
    %c0_i32_0 = arith.constant 0 : i32
    return %arg0, %c0_i32 : i32, i32
  }
  func.func @transform_4(%arg0: i32, %arg1: i32) -> (i32, i32) {
    %c0_i32 = arith.constant 0 : i32
    %c0_i32_0 = arith.constant 0 : i32
    %c0_i32_1 = arith.constant 0 : i32
    return %c0_i32, %c0_i32_0 : i32, i32
  }
  func.func @transform_5(%arg0: i32, %arg1: i32) -> (i32, i32) {
    %c0_i32 = arith.constant 0 : i32
    %c0_i32_0 = arith.constant 0 : i32
    %c0_i32_1 = arith.constant 0 : i32
    return %c0_i32, %c0_i32_0 : i32, i32
  }
  func.func @transform_6(%arg0: i32, %arg1: i32) -> (i32, i32) {
    %c0_i32 = arith.constant 0 : i32
    %c0_i32_0 = arith.constant 0 : i32
    return %arg0, %c0_i32 : i32, i32
  }
}

module attributes {stable_mosaic.version = 11 : i64} {
  func.func @_pooler_head_kernel(%arg0: i32, %arg1: memref<2x32xbf16, #tpu.memory_space<vmem>>, %arg2: memref<32x32xbf16, #tpu.memory_space<vmem>>, %arg3: memref<1x32xf32, #tpu.memory_space<vmem>>, %arg4: memref<1x32xf32, #tpu.memory_space<vmem>>, %arg5: memref<1x32xf32, #tpu.memory_space<vmem>>, %arg6: memref<32x128xbf16, #tpu.memory_space<vmem>>, %arg7: memref<1x128xf32, #tpu.memory_space<vmem>>, %arg8: memref<128x128xbf16, #tpu.memory_space<vmem>>, %arg9: memref<1x128xf32, #tpu.memory_space<vmem>>, %arg10: memref<128x32xbf16, #tpu.memory_space<vmem>>, %arg11: memref<1x32xf32, #tpu.memory_space<vmem>>, %arg12: memref<2x32xf32, #tpu.memory_space<vmem>>) attributes {dimension_semantics = [#tpu.dimension_semantics<arbitrary>], iteration_bounds = array<i64: 1>, scalar_prefetch = 0 : i64, scratch_operands = 0 : i64, tpu.core_type = #tpu.core_type<tc>, window_params = [{pipeline_mode = #tpu.pipeline_mode<synchronous>, transform_indices = @transform_0, window_bounds = array<i64: 2, 32>}, {pipeline_mode = #tpu.pipeline_mode<synchronous>, transform_indices = @transform_1, window_bounds = array<i64: 32, 32>}, {pipeline_mode = #tpu.pipeline_mode<synchronous>, transform_indices = @transform_2, window_bounds = array<i64: 1, 32>}, {pipeline_mode = #tpu.pipeline_mode<synchronous>, transform_indices = @transform_3, window_bounds = array<i64: 1, 32>}, {pipeline_mode = #tpu.pipeline_mode<synchronous>, transform_indices = @transform_4, window_bounds = array<i64: 1, 32>}, {pipeline_mode = #tpu.pipeline_mode<synchronous>, transform_indices = @transform_5, window_bounds = array<i64: 32, 128>}, {pipeline_mode = #tpu.pipeline_mode<synchronous>, transform_indices = @transform_6, window_bounds = array<i64: 1, 128>}, {pipeline_mode = #tpu.pipeline_mode<synchronous>, transform_indices = @transform_7, window_bounds = array<i64: 128, 128>}, {pipeline_mode = #tpu.pipeline_mode<synchronous>, transform_indices = @transform_8, window_bounds = array<i64: 1, 128>}, {pipeline_mode = #tpu.pipeline_mode<synchronous>, transform_indices = @transform_9, window_bounds = array<i64: 128, 32>}, {pipeline_mode = #tpu.pipeline_mode<synchronous>, transform_indices = @transform_10, window_bounds = array<i64: 1, 32>}, {pipeline_mode = #tpu.pipeline_mode<synchronous>, transform_indices = @transform_11, window_bounds = array<i64: 2, 32>}]} {
    %c0 = arith.constant 0 : index
    %c0_0 = arith.constant 0 : index
    %0 = vector.load %arg1[%c0, %c0_0] : memref<2x32xbf16, #tpu.memory_space<vmem>>, vector<2x32xbf16>
    %c0_1 = arith.constant 0 : index
    %c0_2 = arith.constant 0 : index
    %1 = vector.load %arg2[%c0_1, %c0_2] : memref<32x32xbf16, #tpu.memory_space<vmem>>, vector<32x32xbf16>
    %cst = arith.constant dense<0.000000e+00> : vector<2x32xf32>
    %2 = tpu.matmul %0, %1, %cst {dimension_numbers = #tpu.dot_dimension_numbers<[1], [0], [0], [1], [0, 0, 1, 1], [], []>} : vector<2x32xbf16>, vector<32x32xbf16>, vector<2x32xf32> -> vector<2x32xf32>
    %c0_3 = arith.constant 0 : index
    %c0_4 = arith.constant 0 : index
    %3 = vector.load %arg3[%c0_3, %c0_4] : memref<1x32xf32, #tpu.memory_space<vmem>>, vector<1x32xf32>
    %4 = vector.broadcast %3 : vector<1x32xf32> to vector<2x32xf32>
    %5 = arith.addf %2, %4 : vector<2x32xf32>
    %6 = math.tanh %5 : vector<2x32xf32>
    %cst_5 = arith.constant dense<0.000000e+00> : vector<2xf32>
    %7 = vector.multi_reduction <add>, %6, %cst_5 [1] : vector<2x32xf32> to vector<2xf32>
    %8 = vector.shape_cast %7 : vector<2xf32> to vector<2x1xf32>
    %cst_6 = arith.constant 3.200000e+01 : f32
    %9 = vector.broadcast %cst_6 : f32 to vector<2x1xf32>
    %10 = arith.divf %8, %9 : vector<2x1xf32>
    %11 = vector.broadcast %10 : vector<2x1xf32> to vector<2x32xf32>
    %12 = arith.subf %6, %11 : vector<2x32xf32>
    %13 = arith.mulf %12, %12 : vector<2x32xf32>
    %cst_7 = arith.constant dense<0.000000e+00> : vector<2xf32>
    %14 = vector.multi_reduction <add>, %13, %cst_7 [1] : vector<2x32xf32> to vector<2xf32>
    %15 = vector.shape_cast %14 : vector<2xf32> to vector<2x1xf32>
    %cst_8 = arith.constant 3.200000e+01 : f32
    %16 = vector.broadcast %cst_8 : f32 to vector<2x1xf32>
    %17 = arith.divf %15, %16 : vector<2x1xf32>
    %cst_9 = arith.constant 9.99999974E-6 : f32
    %18 = vector.broadcast %cst_9 : f32 to vector<2x1xf32>
    %19 = arith.addf %17, %18 : vector<2x1xf32>
    %20 = math.rsqrt %19 : vector<2x1xf32>
    %21 = vector.broadcast %20 : vector<2x1xf32> to vector<2x32xf32>
    %22 = arith.mulf %12, %21 : vector<2x32xf32>
    %c0_10 = arith.constant 0 : index
    %c0_11 = arith.constant 0 : index
    %23 = vector.load %arg4[%c0_10, %c0_11] : memref<1x32xf32, #tpu.memory_space<vmem>>, vector<1x32xf32>
    %24 = vector.broadcast %23 : vector<1x32xf32> to vector<2x32xf32>
    %25 = arith.mulf %22, %24 : vector<2x32xf32>
    %c0_12 = arith.constant 0 : index
    %c0_13 = arith.constant 0 : index
    %26 = vector.load %arg5[%c0_12, %c0_13] : memref<1x32xf32, #tpu.memory_space<vmem>>, vector<1x32xf32>
    %27 = vector.broadcast %26 : vector<1x32xf32> to vector<2x32xf32>
    %28 = arith.addf %25, %27 : vector<2x32xf32>
    %29 = arith.truncf %28 : vector<2x32xf32> to vector<2x32xbf16>
    %c0_14 = arith.constant 0 : index
    %c0_15 = arith.constant 0 : index
    %30 = vector.load %arg6[%c0_14, %c0_15] : memref<32x128xbf16, #tpu.memory_space<vmem>>, vector<32x128xbf16>
    %cst_16 = arith.constant dense<0.000000e+00> : vector<2x128xf32>
    %31 = tpu.matmul %29, %30, %cst_16 {dimension_numbers = #tpu.dot_dimension_numbers<[1], [0], [0], [1], [0, 0, 1, 1], [], []>} : vector<2x32xbf16>, vector<32x128xbf16>, vector<2x128xf32> -> vector<2x128xf32>
    %c0_17 = arith.constant 0 : index
    %c0_18 = arith.constant 0 : index
    %32 = vector.load %arg7[%c0_17, %c0_18] : memref<1x128xf32, #tpu.memory_space<vmem>>, vector<1x128xf32>
    %33 = vector.broadcast %32 : vector<1x128xf32> to vector<2x128xf32>
    %34 = arith.addf %31, %33 : vector<2x128xf32>
    %cst_19 = arith.constant 0.000000e+00 : f32
    %35 = vector.broadcast %cst_19 : f32 to vector<2x128xf32>
    %36 = arith.maximumf %34, %35 : vector<2x128xf32>
    %37 = arith.truncf %36 : vector<2x128xf32> to vector<2x128xbf16>
    %c0_20 = arith.constant 0 : index
    %c0_21 = arith.constant 0 : index
    %38 = vector.load %arg8[%c0_20, %c0_21] : memref<128x128xbf16, #tpu.memory_space<vmem>>, vector<128x128xbf16>
    %cst_22 = arith.constant dense<0.000000e+00> : vector<2x128xf32>
    %39 = tpu.matmul %37, %38, %cst_22 {dimension_numbers = #tpu.dot_dimension_numbers<[1], [0], [0], [1], [0, 0, 1, 1], [], []>} : vector<2x128xbf16>, vector<128x128xbf16>, vector<2x128xf32> -> vector<2x128xf32>
    %c0_23 = arith.constant 0 : index
    %c0_24 = arith.constant 0 : index
    %40 = vector.load %arg9[%c0_23, %c0_24] : memref<1x128xf32, #tpu.memory_space<vmem>>, vector<1x128xf32>
    %41 = vector.broadcast %40 : vector<1x128xf32> to vector<2x128xf32>
    %42 = arith.addf %39, %41 : vector<2x128xf32>
    %cst_25 = arith.constant 0.000000e+00 : f32
    %43 = vector.broadcast %cst_25 : f32 to vector<2x128xf32>
    %44 = arith.maximumf %42, %43 : vector<2x128xf32>
    %45 = arith.truncf %44 : vector<2x128xf32> to vector<2x128xbf16>
    %c0_26 = arith.constant 0 : index
    %c0_27 = arith.constant 0 : index
    %46 = vector.load %arg10[%c0_26, %c0_27] : memref<128x32xbf16, #tpu.memory_space<vmem>>, vector<128x32xbf16>
    %cst_28 = arith.constant dense<0.000000e+00> : vector<2x32xf32>
    %47 = tpu.matmul %45, %46, %cst_28 {dimension_numbers = #tpu.dot_dimension_numbers<[1], [0], [0], [1], [0, 0, 1, 1], [], []>} : vector<2x128xbf16>, vector<128x32xbf16>, vector<2x32xf32> -> vector<2x32xf32>
    %c0_29 = arith.constant 0 : index
    %c0_30 = arith.constant 0 : index
    %48 = vector.load %arg11[%c0_29, %c0_30] : memref<1x32xf32, #tpu.memory_space<vmem>>, vector<1x32xf32>
    %49 = vector.broadcast %48 : vector<1x32xf32> to vector<2x32xf32>
    %50 = arith.addf %47, %49 : vector<2x32xf32>
    %cst_31 = arith.constant 0.000000e+00 : f32
    %51 = vector.broadcast %cst_31 : f32 to vector<2x32xf32>
    %52 = arith.maximumf %50, %51 : vector<2x32xf32>
    %c0_32 = arith.constant 0 : index
    %c0_33 = arith.constant 0 : index
    %53 = vector.load %arg12[%c0_32, %c0_33] : memref<2x32xf32, #tpu.memory_space<vmem>>, vector<2x32xf32>
    tpu.vector_store %arg12[%c0_32, %c0_33], %52 {strides = array<i32>} : memref<2x32xf32, #tpu.memory_space<vmem>>, vector<2x32xf32>,
    return
  }
  func.func @transform_0(%arg0: i32) -> (i32, i32) {
    %c0_i32 = arith.constant 0 : i32
    %c0_i32_0 = arith.constant 0 : i32
    %c0_i32_1 = arith.constant 0 : i32
    return %c0_i32, %c0_i32_0 : i32, i32
  }
  func.func @transform_1(%arg0: i32) -> (i32, i32) {
    %c0_i32 = arith.constant 0 : i32
    %c0_i32_0 = arith.constant 0 : i32
    %c0_i32_1 = arith.constant 0 : i32
    return %c0_i32, %c0_i32_0 : i32, i32
  }
  func.func @transform_2(%arg0: i32) -> (i32, i32) {
    %c0_i32 = arith.constant 0 : i32
    %c0_i32_0 = arith.constant 0 : i32
    %c0_i32_1 = arith.constant 0 : i32
    return %c0_i32, %c0_i32_0 : i32, i32
  }
  func.func @transform_3(%arg0: i32) -> (i32, i32) {
    %c0_i32 = arith.constant 0 : i32
    %c0_i32_0 = arith.constant 0 : i32
    %c0_i32_1 = arith.constant 0 : i32
    return %c0_i32, %c0_i32_0 : i32, i32
  }
  func.func @transform_4(%arg0: i32) -> (i32, i32) {
    %c0_i32 = arith.constant 0 : i32
    %c0_i32_0 = arith.constant 0 : i32
    %c0_i32_1 = arith.constant 0 : i32
    return %c0_i32, %c0_i32_0 : i32, i32
  }
  func.func @transform_5(%arg0: i32) -> (i32, i32) {
    %c0_i32 = arith.constant 0 : i32
    %c0_i32_0 = arith.constant 0 : i32
    %c0_i32_1 = arith.constant 0 : i32
    return %c0_i32, %c0_i32_0 : i32, i32
  }
  func.func @transform_6(%arg0: i32) -> (i32, i32) {
    %c0_i32 = arith.constant 0 : i32
    %c0_i32_0 = arith.constant 0 : i32
    %c0_i32_1 = arith.constant 0 : i32
    return %c0_i32, %c0_i32_0 : i32, i32
  }
  func.func @transform_7(%arg0: i32) -> (i32, i32) {
    %c0_i32 = arith.constant 0 : i32
    %c0_i32_0 = arith.constant 0 : i32
    %c0_i32_1 = arith.constant 0 : i32
    return %c0_i32, %c0_i32_0 : i32, i32
  }
  func.func @transform_8(%arg0: i32) -> (i32, i32) {
    %c0_i32 = arith.constant 0 : i32
    %c0_i32_0 = arith.constant 0 : i32
    %c0_i32_1 = arith.constant 0 : i32
    return %c0_i32, %c0_i32_0 : i32, i32
  }
  func.func @transform_9(%arg0: i32) -> (i32, i32) {
    %c0_i32 = arith.constant 0 : i32
    %c0_i32_0 = arith.constant 0 : i32
    %c0_i32_1 = arith.constant 0 : i32
    return %c0_i32, %c0_i32_0 : i32, i32
  }
  func.func @transform_10(%arg0: i32) -> (i32, i32) {
    %c0_i32 = arith.constant 0 : i32
    %c0_i32_0 = arith.constant 0 : i32
    %c0_i32_1 = arith.constant 0 : i32
    return %c0_i32, %c0_i32_0 : i32, i32
  }
  func.func @transform_11(%arg0: i32) -> (i32, i32) {
    %c0_i32 = arith.constant 0 : i32
    %c0_i32_0 = arith.constant 0 : i32
    %c0_i32_1 = arith.constant 0 : i32
    return %c0_i32, %c0_i32_0 : i32, i32
  }
}

</mosaic_0001>

<bundles_post_ra>
// kernel: bert_classifier_forward.12
= control target key start
LH: loop header
LB: loop body
LE: loop exit
PB: predicated region body
PF: predicated region fallthrough
CT: control target
= control target key end

     0   :  { %vm16_vm0 = vcmask 261120   ;;  %vm70_vm1 = vcmask 257024   ;;  %s129_s0 = inlined_call_operand.vmem [shape: f32[16,32], index: 0, kind: input, shape index: {}]   ;;  %s130_s1 = inlined_call_operand.vmem [shape: f32[1,32], index: 1, kind: input, shape index: {}]   ;;  %s131_s2 = inlined_call_operand.vmem [shape: f32[1,32], index: 2, kind: input, shape index: {}]   ;;  %s132_s3 = inlined_call_operand.vmem [shape: bf16[16,32], index: 3, kind: output, shape index: {}]  }
   0x1   :  { %v14_v0 = vld [vmem:[%s129_s0] sm:$0xff]  ;;  %v15_v1 = vld [vmem:[%s129_s0 + $0x8] sm:$0xff] }
   0x2   :  { %v17_v2 = vsel %vm16_vm0, %v14_v0, 0.0  ;;  %v20_v3 = vsel %vm16_vm0, %v15_v1, 0.0  ;;  %v77_v21 = vld [vmem:[%s130_s1] ss:$0 sm:$0xff] }
   0x3   :  { %18 = vadd.xlane.f32.xlu0 %v17_v2  ;;  %v78_v23 = vld [vmem:[%s131_s2] ss:$0 sm:$0xff] }
   0x7   :  { %21 = vadd.xlane.f32.xlu0 %v20_v3 }
  0x8c   :  { %v19_v4 = vpop.xlane.xlu0 %18 }
  0x8d   :  { %v24_v5 = vmul.f32 0.03125, %v19_v4 }
  0x8f   :  { %v26_v6 = vsub.f32 %v14_v0, %v24_v5 }
  0x90   :  { %v22_v7 = vpop.xlane.xlu0 %21 }
  0x91   :  { %v25_v8 = vmul.f32 0.03125, %v22_v7  ;;  %v28_v9 = vmul.f32 %v26_v6, %v26_v6 }
  0x93   :  { %v27_v10 = vsub.f32 %v15_v1, %v25_v8  ;;  %v30_v11 = vsel %vm16_vm0, %v28_v9, 0.0 }
  0x94   :  { %31 = vadd.xlane.f32.xlu1 %v30_v11 }
  0x95   :  { %v29_v12 = vmul.f32 %v27_v10, %v27_v10 }
  0x97   :  { %v33_v13 = vsel %vm16_vm0, %v29_v12, 0.0 }
  0x98   :  { %34 = vadd.xlane.f32.xlu1 %v33_v13 }
 0x11d   :  { %v32_v14 = vpop.xlane.xlu1 %31 }
 0x11e   :  { %v36_v15 = vmul.f32 0.03125, %v32_v14 }
 0x120   :  { %v38_v16 = vadd.f32 1e-12, %v36_v15 }
 0x121   :  { %v35_v17 = vpop.xlane.xlu1 %34 }
 0x122   :  { %83 = vrsqrt.f32 %v38_v16  ;;  %v37_v18 = vmul.f32 0.03125, %v35_v17 }
 0x124   :  { %v39_v19 = vadd.f32 1e-12, %v37_v18 }
 0x126   :  { %85 = vrsqrt.f32 %v39_v19 }
 0x12f   :  { %v84_v20 = vpop.eup %83 }
 0x130   :  { %v42_v22 = vmul.f32 %v84_v20, %v26_v6 }
 0x132   :  { %v51_v24 = vmul.f32 %v77_v21, %v42_v22 }
 0x133   :  { %v86_v25 = vpop.eup %85 }
 0x134   :  { %v60_v26 = vadd.f32 %v78_v23, %v51_v24  ;;  %v43_v27 = vmul.f32 %v86_v25, %v27_v10 }
 0x136   :  { %v81_v28 = vpack.c.bf16 %v60_v26, %v60_v26  ;;  %v52_v29 = vmul.f32 %v77_v21, %v43_v27 }
 0x138   :  { %71 = vst.msk [vmem:[%s132_s3] sm:$0xf] %vm70_vm1, %v81_v28  ;;  %v61_v30 = vadd.f32 %v78_v23, %v52_v29 }
 0x13a   :  { %v82_v31 = vpack.c.bf16 %v61_v30, %v61_v30 }
 0x13c   :  { %72 = vst.msk [vmem:[%s132_s3 + $0x4] sm:$0xf] %vm70_vm1, %v82_v31 }

// kernel: bert_classifier_forward.13
= control target key start
LH: loop header
LB: loop body
LE: loop exit
PB: predicated region body
PF: predicated region fallthrough
CT: control target
= control target key end

     0   :  { %vm19_vm0 = vcmask 785408   ;;  %v151_v0 = vmov 0.0   ;;  %vm152_vm1 = vmmov 0   ;;  %vm47_vm2 = vcmask 261120   ;;  %s195_s1 = inlined_call_operand.vmem [shape: bf16[32,96], index: 1, kind: input, shape index: {}]   ;;  %s196_s0 = inlined_call_operand.vmem [shape: bf16[16,32], index: 0, kind: input, shape index: {}]   ;;  %s197_s2 = inlined_call_operand.vmem [shape: f32[1,96], index: 2, kind: input, shape index: {}]   ;;  %s198_s3 = inlined_call_operand.vmem [shape: bf16[16,96], index: 3, kind: output, shape index: {}]  }
   0x1   :  { %138 = vmatprep.subr.bf16.mxu0 %v151_v0  ;;  %v148_v1 = vld [vmem:[%s195_s1 + $0x8] sm:$0xff]   ;;  %142 = vmatprep.mubr.msk.bf16.mxu0 %vm152_vm1, %v151_v0  ;;  %20 = vst.msk [vmem:[#allocation2] sm:$0xff] %vm19_vm0, %v151_v0  ;;  %21 = vst.msk [vmem:[#allocation2 + $0x8] sm:$0xff] %vm19_vm0, %v151_v0  ;;  %v149_v2 = vld [vmem:[%s195_s1] sm:$0xff]   ;;  %vm119_vm3 = vcmask 781312  }
   0x2   :  { %139 = vmatpush3.bf16.msra.mxu0 %v148_v1  ;;  %v150_v3 = vld [vmem:[%s196_s0] sm:$0xff]  }
   0x3   :  { %140 = vmatprep.subr.bf16.mxu0 %v151_v0  ;;  %v130_v12 = vld [vmem:[%s197_s2] ss:$0 sm:$0xff] }
   0x6   :  { %141 = vmatpush3.bf16.msra.mxu0 %v149_v2 }
   0x8   :  { %v22_v4 = vld [vmem:[#allocation2] sm:$0xff]  ;;  %v23_v8 = vld [vmem:[#allocation2 + $0x8] sm:$0xff] }
   0x9   :  { %143 = vmatmul.mubr.msk.bf16.vlgmr.msra.gmra.mxu0 %vm47_vm2, %v150_v3 }
  0xc9   :  { %v85_v5 = vpop.f32.mrf.mxu0 }
  0xca   :  { %v92_v6 = vadd.f32 %v85_v5, %v22_v4 }
  0xcb   :  { %v144_v7 = vpop.f32.mrf.mxu0 }
  0xcc   :  { %95 = vst.msk [vmem:[#allocation2] sm:$0xff] %vm19_vm0, %v92_v6 }
  0xcd   :  { %v88_v9 = vpop.f32.mrf.mxu0 }
  0xce   :  { %v93_v10 = vadd.f32 %v88_v9, %v23_v8 }
  0xcf   :  { %v145_v11 = vpop.f32.mrf.mxu0 }
  0xd0   :  { %96 = vst.msk [vmem:[#allocation2 + $0x8] sm:$0xff] %vm19_vm0, %v93_v10 }
  0xd3   :  { %v100_v13 = vld [vmem:[#allocation2] sm:$0xff] }
  0xd4   :  { %v109_v14 = vadd.f32 %v130_v12, %v100_v13 }
  0xd6   :  { %v133_v15 = vpack.c.bf16 %v109_v14, %v109_v14 }
  0xd7   :  { %v101_v16 = vld [vmem:[#allocation2 + $0x8] sm:$0xff] }
  0xd8   :  { %120 = vst.msk [vmem:[%s198_s3] sm:$0xf] %vm119_vm3, %v133_v15  ;;  %v110_v17 = vadd.f32 %v130_v12, %v101_v16 }
  0xda   :  { %v134_v18 = vpack.c.bf16 %v110_v17, %v110_v17 }
  0xdc   :  { %121 = vst.msk [vmem:[%s198_s3 + $0x4] sm:$0xf] %vm119_vm3, %v134_v18 }

// kernel: bert_classifier_forward.14
= control target key start
LH: loop header
LB: loop body
LE: loop exit
PB: predicated region body
PF: predicated region fallthrough
CT: control target
= control target key end

     0   :  { %s774_s15 = smov 0   ;;  %s776_s16 = smov 0   ;;  %s840_s0 = inlined_call_operand.vmem [shape: bf16[2,2,8,16], index: 0, kind: input, shape index: {}]   ;;  %s841_s1 = inlined_call_operand.vmem [shape: bf16[2,2,8,16], index: 1, kind: input, shape index: {}]   ;;  %s842_s2 = inlined_call_operand.vmem [shape: bf16[2,2,8,16], index: 2, kind: input, shape index: {}]   ;;  %s843_s3 = inlined_call_operand.vmem [shape: f32[2,1,8], index: 3, kind: input, shape index: {}]   ;;  %s844_s4 = inlined_call_operand.vmem [shape: bf16[2,8,32], index: 4, kind: output, shape index: {}]  }
   0x1   :  { %s778_s17 = smov 0  }
   0x2 LB: > { %s26_s18 = sadd.s32 1, %s740_s16  ;;  %p635_p0 = scmp.ge.s32.totalorder %s744_s17, 1  ;;  %s744_s17 = sphi %s778_s17, %s14_s17   ;;  %s740_s16 = sphi %s776_s16, %s846_s16   ;;  %s736_s15 = sphi %s774_s15, %s845_s15  }
   0x3   : > { %p28_p1 = scmp.ge.s32.totalorder %s26_s18, 2  ;;  %p209_p2 = scmp.lt.s32.totalorder %s744_s17, 3 }
   0x5   : > { %s848_s18 = smov (%p28_p1, %s26_s18), 0  ;;  %p210_p3 = pnand %p635_p0, %p209_p2 }
   0x6   : > { %p253_p4 = scmp.lt.s32.totalorder (!%p210_p3), %s736_s15, 1  ;;  %s748_s7 = smov (!%p210_p3), 16  }
   0x7   : > { %213 = sbr.rel (%p210_p3) target bundleno = 691 (0x2b3), region = 36 }
   0xc   : > { %v746_v0 = vmov 0.0   ;;  %s850_s15 = smov (!%p253_p4, %s736_s15), 1  ;;  %vm747_vm0 = vmmov 0   ;;  %vm298_vm1 = vcmask 130048   ;;  %vm391_vm2 = vcmask 64512  }
   0xd   : > { %669 = vmatprep.subr.bf16.mxu1 %v746_v0  ;;  %663 = vmatprep.subr.bf16.mxu0 %v746_v0  ;;  %s797_s19 = sshll.u32 %s850_s15, 3  ;;  %s273_s28 = scalar_lea.vmem %s843_s3, %s850_s15  ;;  %vm415_vm3 = vcmask 1043456   ;;  %vm510_vm4 = vcmask 125952   ;;  %vm519_vm5 = vcmask 257152  }
   0xe   : > { %671 = vmatprep.mubr.msk.bf16.mxu1 %vm747_vm0, %v746_v0  ;;  %665 = vmatprep.mubr.msk.bf16.mxu0 %vm747_vm0, %v746_v0  ;;  %s260_s22 = scalar_lea.vmem %s840_s0, %s797_s19  ;;  %s265_s25 = scalar_lea.vmem %s841_s1, %s797_s19  ;;  %v643_v9 = vld [vmem:[%s273_s28] ss:$0 sm:$0xff] }
   0xf   : > { %v288_v1 = vld [vmem:[%s265_s25 + $0x4] sm:$0xf]  ;;  %v287_v2 = vld [vmem:[%s265_s25] sm:$0xf]  ;;  %s270_s5 = scalar_lea.vmem %s842_s2, %s797_s19  ;;  %s642_s6 = sshll.u32 %s850_s15, 2 }
  0x10   : > { %v349_v3 = vsel %vm298_vm1, %v288_v1, 0  ;;  %v303_v4 = vsel %vm298_vm1, %v287_v2, 0  ;;  %v284_v5 = vld [vmem:[%s260_s22 + $0x4] sm:$0xf]  ;;  %v283_v6 = vld [vmem:[%s260_s22] sm:$0xf]  ;;  %s280_s10 = scalar_lea.vmem %s844_s4, %s642_s6 }
  0x11   : > { %670 = vmatpush3.bf16.xpose.msra.mxu1 %v349_v3  ;;  %664 = vmatpush3.bf16.xpose.msra.mxu0 %v303_v4  ;;  %v286_v7 = vmul.bf16 1048592000, %v284_v5  ;;  %v285_v8 = vmul.bf16 1048592000, %v283_v6  ;;  %v290_v22 = vld [vmem:[%s270_s5 + $0x4] sm:$0xf] }
  0x12   : > { %681 = vmatprep.subr.bf16.mxu1 %v746_v0  ;;  %675 = vmatprep.subr.bf16.mxu0 %v746_v0  ;;  %v463_v23 = vsel %vm415_vm3, %v290_v22, 0  ;;  %v289_v24 = vld [vmem:[%s270_s5] sm:$0xf] }
  0x13   : > { %v417_v25 = vsel %vm415_vm3, %v289_v24, 0 }
  0x18   : > { %672 = vmatmul.mubr.msk.bf16.vlgmr.msra.gmra.mxu1 %vm298_vm1, %v286_v7  ;;  %666 = vmatmul.mubr.msk.bf16.vlgmr.msra.gmra.mxu0 %vm298_vm1, %v285_v8 }
  0x19   : > { %683 = vmatprep.mubr.msk.bf16.mxu1 %vm747_vm0, %v746_v0  ;;  %677 = vmatprep.mubr.msk.bf16.mxu0 %vm747_vm0, %v746_v0 }
  0x1a   : > { %682 = vmatpush3.bf16.msra.mxu1 %v463_v23  ;;  %676 = vmatpush3.bf16.msra.mxu0 %v417_v25 }
  0xd8   : > { %v385_v10 = vpop.f32.mrf.mxu1  ;;  %v339_v11 = vpop.f32.mrf.mxu0 }
  0xd9   : > { %v386_v12 = vadd.f32 %v643_v9, %v385_v10  ;;  %v340_v13 = vadd.f32 %v643_v9, %v339_v11 }
  0xda   : > { %v673_v14 = vpop.f32.mrf.mxu1  ;;  %v667_v15 = vpop.f32.mrf.mxu0 }
  0xdb   : > { %v395_v16 = vsel %vm391_vm2, %v386_v12, -inf  ;;  %v392_v19 = vsel %vm391_vm2, %v340_v13, -inf }
  0xdc   : > { %396 = vmax.xlane.f32.xlu0 %v395_v16  ;;  %v388_v17 = vpop.f32.mrf.mxu1  ;;  %v342_v18 = vpop.f32.mrf.mxu0 }
  0xde   : > { %v674_v20 = vpop.f32.mrf.mxu1  ;;  %v668_v21 = vpop.f32.mrf.mxu0 }
  0xe0   : > { %393 = vmax.xlane.f32.xlu0 %v392_v19 }
 0x165   : > { %v397_v26 = vpop.xlane.xlu0 %396 }
 0x166   : > { %v399_v27 = vsub.f32 %v386_v12, %v397_v26 }
 0x168   : > { %v402_v28 = vmul.f32 1.442695, %v399_v27 }
 0x169   : > { %v394_v29 = vpop.xlane.xlu0 %393 }
 0x16a   : > { %714 = vpow2.f32 %v402_v28  ;;  %v398_v30 = vsub.f32 %v340_v13, %v394_v29 }
 0x16c   : > { %v400_v31 = vmul.f32 1.442695, %v398_v30 }
 0x16e   : > { %716 = vpow2.f32 %v400_v31 }
 0x177   : > { %v715_v32 = vpop.eup %714 }
 0x178   : > { %v407_v33 = vsel %vm391_vm2, %v715_v32, 0.0  ;;  %v411_v34 = vpack.c.bf16 %v715_v32, %v715_v32 }
 0x179   : > { %408 = vadd.xlane.f32.xlu1 %v407_v33 }
 0x17a   : > { %684 = vmatmul.mubr.msk.bf16.vlgmr.msra.gmra.mxu1 %vm391_vm2, %v411_v34 }
 0x17b   : > { %v717_v35 = vpop.eup %716 }
 0x17c   : > { %v404_v36 = vsel %vm391_vm2, %v717_v35, 0.0  ;;  %v410_v37 = vpack.c.bf16 %v717_v35, %v717_v35 }
 0x17d   : > { %405 = vadd.xlane.f32.xlu1 %v404_v36 }
 0x17e   : > { %678 = vmatmul.mubr.msk.bf16.vlgmr.msra.gmra.mxu0 %vm391_vm2, %v410_v37 }
 0x202   : > { %v409_v38 = vpop.xlane.xlu1 %408 }
 0x203   : > { %718 = vrcp.f32 %v409_v38 }
 0x206   : > { %v406_v39 = vpop.xlane.xlu1 %405 }
 0x207   : > { %720 = vrcp.f32 %v406_v39 }
 0x210   : > { %v719_v40 = vpop.eup %718 }
 0x214   : > { %v721_v45 = vpop.eup %720 }
 0x23a   : > { %v499_v41 = vpop.f32.mrf.mxu1 }
 0x23b   : > { %v508_v42 = vmul.f32 %v719_v40, %v499_v41 }
 0x23c   : > { %v685_v43 = vpop.f32.mrf.mxu1 }
 0x23d   : > { %v654_v44 = vpack.c.bf16 %v508_v42, %v508_v42 }
 0x23e   : > { %v453_v46 = vpop.f32.mrf.mxu0  ;;  %v502_v47 = vpop.f32.mrf.mxu1 }
 0x23f   : > { %v507_v48 = vmul.f32 %v721_v45, %v453_v46  ;;  %516 = vrot.lane.b32.xlu0 %v654_v44, %s748_s7 }
 0x240   : > { %v679_v49 = vpop.f32.mrf.mxu0  ;;  %v686_v50 = vpop.f32.mrf.mxu1 }
 0x241   : > { %v509_v51 = vpack.c.bf16 %v507_v48, %v507_v48 }
 0x242   : > { %v456_v52 = vpop.f32.mrf.mxu0 }
 0x243   : > { %511 = vst.msk [vmem:[%s280_s10] sm:$0xf] %vm510_vm4, %v509_v51 }
 0x244   : > { %v680_v53 = vpop.f32.mrf.mxu0 }
 0x2b1   : > { %v517_v54 = vpop.permute.xlu0 %516 }
 0x2b2   : > { %520 = vst.msk [vmem:[%s280_s10] sm:$0xf] %vm519_vm5, %v517_v54 }
 0x2b3 PF: > { %s14_s17 = sadd.s32 1, %s744_s17   ;;  %s845_s15 = smov %s740_s16 }
 0x2b4   : > { %p11_p5 = scmp.ge.s32.totalorder %s14_s17, 4   ;;  %s846_s16 = smov %s848_s18 }
 0x2b6   :  { %13 = sbr.rel (!%p11_p5) target bundleno = 2 (0x2), region = 75 }

// kernel: bert_classifier_forward.15
= control target key start
LH: loop header
LB: loop body
LE: loop exit
PB: predicated region body
PF: predicated region fallthrough
CT: control target
= control target key end

     0   :  { %vm28_vm0 = vcmask 261120   ;;  %v220_v0 = vmov 0.0   ;;  %vm221_vm1 = vmmov 0   ;;  %vm178_vm2 = vcmask 257024   ;;  %s293_s1 = inlined_call_operand.vmem [shape: bf16[32,32], index: 1, kind: input, shape index: {}]   ;;  %s294_s0 = inlined_call_operand.vmem [shape: bf16[16,32], index: 0, kind: input, shape index: {}]   ;;  %s295_s3 = inlined_call_operand.vmem [shape: bf16[16,32], index: 3, kind: input, shape index: {}]   ;;  %s296_s2 = inlined_call_operand.vmem [shape: f32[1,32], index: 2, kind: input, shape index: {}]   ;;  %s297_s4 = inlined_call_operand.vmem [shape: f32[1,32], index: 4, kind: input, shape index: {}]   ;;  %s298_s5 = inlined_call_operand.vmem [shape: f32[1,32], index: 5, kind: input, shape index: {}]   ;;  %s299_s6 = inlined_call_operand.vmem [shape: bf16[16,32], index: 6, kind: output, shape index: {}]  }
   0x1   :  { %203 = vmatprep.subr.bf16.mxu0 %v220_v0  ;;  %v213_v1 = vld [vmem:[%s293_s1 + $0x8] sm:$0xff]   ;;  %207 = vmatprep.mubr.msk.bf16.mxu0 %vm221_vm1, %v220_v0  ;;  %29 = vst.msk [vmem:[#allocation2] sm:$0xff] %vm28_vm0, %v220_v0  ;;  %30 = vst.msk [vmem:[#allocation2 + $0x8] sm:$0xff] %vm28_vm0, %v220_v0  ;;  %v214_v2 = vld [vmem:[%s293_s1] sm:$0xff]  }
   0x2   :  { %204 = vmatpush3.bf16.msra.mxu0 %v213_v1  ;;  %v215_v3 = vld [vmem:[%s294_s0] sm:$0xff]  }
   0x3   :  { %205 = vmatprep.subr.bf16.mxu0 %v220_v0  ;;  %v197_v12 = vld [vmem:[%s295_s3] sm:$0xff]  }
   0x4   :  { %v189_v13 = vld [vmem:[%s296_s2] ss:$0 sm:$0xff]  ;;  %v198_v14 = vunpack.c.l.bf16 %v197_v12  ;;  %v199_v18 = vunpack.c.h.bf16 %v197_v12 }
   0x5   :  { %v190_v41 = vld [vmem:[%s297_s4] ss:$0 sm:$0xff] }
   0x6   :  { %206 = vmatpush3.bf16.msra.mxu0 %v214_v2  ;;  %v191_v43 = vld [vmem:[%s298_s5] ss:$0 sm:$0xff] }
   0x8   :  { %v31_v4 = vld [vmem:[#allocation2] sm:$0xff]  ;;  %v32_v8 = vld [vmem:[#allocation2 + $0x8] sm:$0xff] }
   0x9   :  { %208 = vmatmul.mubr.msk.bf16.vlgmr.msra.gmra.mxu0 %vm28_vm0, %v215_v3 }
  0xc9   :  { %v94_v5 = vpop.f32.mrf.mxu0 }
  0xca   :  { %v101_v6 = vadd.f32 %v94_v5, %v31_v4 }
  0xcb   :  { %v209_v7 = vpop.f32.mrf.mxu0 }
  0xcc   :  { %103 = vst.msk [vmem:[#allocation2] sm:$0xff] %vm28_vm0, %v101_v6 }
  0xcd   :  { %v97_v9 = vpop.f32.mrf.mxu0 }
  0xce   :  { %v102_v10 = vadd.f32 %v97_v9, %v32_v8 }
  0xcf   :  { %v210_v11 = vpop.f32.mrf.mxu0 }
  0xd0   :  { %104 = vst.msk [vmem:[#allocation2 + $0x8] sm:$0xff] %vm28_vm0, %v102_v10 }
  0xd3   :  { %v108_v15 = vld [vmem:[#allocation2] sm:$0xff] }
  0xd4   :  { %v117_v16 = vadd.f32 %v189_v13, %v108_v15 }
  0xd6   :  { %v123_v17 = vadd.f32 %v198_v14, %v117_v16 }
  0xd7   :  { %v109_v19 = vld [vmem:[#allocation2 + $0x8] sm:$0xff] }
  0xd8   :  { %v125_v20 = vsel %vm28_vm0, %v123_v17, 0.0  ;;  %v118_v21 = vadd.f32 %v189_v13, %v109_v19 }
  0xd9   :  { %126 = vadd.xlane.f32.xlu0 %v125_v20 }
  0xda   :  { %v124_v22 = vadd.f32 %v199_v18, %v118_v21 }
  0xdc   :  { %v128_v23 = vsel %vm28_vm0, %v124_v22, 0.0 }
  0xdd   :  { %129 = vadd.xlane.f32.xlu0 %v128_v23 }
 0x162   :  { %v127_v24 = vpop.xlane.xlu0 %126 }
 0x163   :  { %v132_v25 = vmul.f32 0.03125, %v127_v24 }
 0x165   :  { %v134_v26 = vsub.f32 %v123_v17, %v132_v25 }
 0x166   :  { %v130_v27 = vpop.xlane.xlu0 %129 }
 0x167   :  { %v133_v28 = vmul.f32 0.03125, %v130_v27  ;;  %v136_v29 = vmul.f32 %v134_v26, %v134_v26 }
 0x169   :  { %v135_v30 = vsub.f32 %v124_v22, %v133_v28  ;;  %v138_v31 = vsel %vm28_vm0, %v136_v29, 0.0 }
 0x16a   :  { %139 = vadd.xlane.f32.xlu1 %v138_v31 }
 0x16b   :  { %v137_v32 = vmul.f32 %v135_v30, %v135_v30 }
 0x16d   :  { %v141_v33 = vsel %vm28_vm0, %v137_v32, 0.0 }
 0x16e   :  { %142 = vadd.xlane.f32.xlu1 %v141_v33 }
 0x1f3   :  { %v140_v34 = vpop.xlane.xlu1 %139 }
 0x1f4   :  { %v144_v35 = vmul.f32 0.03125, %v140_v34 }
 0x1f6   :  { %v146_v36 = vadd.f32 1e-12, %v144_v35 }
 0x1f7   :  { %v143_v37 = vpop.xlane.xlu1 %142 }
 0x1f8   :  { %216 = vrsqrt.f32 %v146_v36  ;;  %v145_v38 = vmul.f32 0.03125, %v143_v37 }
 0x1fa   :  { %v147_v39 = vadd.f32 1e-12, %v145_v38 }
 0x1fc   :  { %218 = vrsqrt.f32 %v147_v39 }
 0x205   :  { %v217_v40 = vpop.eup %216 }
 0x206   :  { %v150_v42 = vmul.f32 %v217_v40, %v134_v26 }
 0x208   :  { %v159_v44 = vmul.f32 %v190_v41, %v150_v42 }
 0x209   :  { %v219_v45 = vpop.eup %218 }
 0x20a   :  { %v168_v46 = vadd.f32 %v191_v43, %v159_v44  ;;  %v151_v47 = vmul.f32 %v219_v45, %v135_v30 }
 0x20c   :  { %v194_v48 = vpack.c.bf16 %v168_v46, %v168_v46  ;;  %v160_v49 = vmul.f32 %v190_v41, %v151_v47 }
 0x20e   :  { %179 = vst.msk [vmem:[%s299_s6] sm:$0xf] %vm178_vm2, %v194_v48  ;;  %v169_v50 = vadd.f32 %v191_v43, %v160_v49 }
 0x210   :  { %v195_v51 = vpack.c.bf16 %v169_v50, %v169_v50 }
 0x212   :  { %180 = vst.msk [vmem:[%s299_s6 + $0x4] sm:$0xf] %vm178_vm2, %v195_v51 }

// kernel: bert_classifier_forward.16
= control target key start
LH: loop header
LB: loop body
LE: loop exit
PB: predicated region body
PF: predicated region fallthrough
CT: control target
= control target key end

     0   :  { %v175_v0 = vmov 0.0   ;;  %vm176_vm0 = vmmov 0   ;;  %vm46_vm1 = vcmask 261120   ;;  %s212_s1 = inlined_call_operand.vmem [shape: bf16[32,128], index: 1, kind: input, shape index: {}]   ;;  %s213_s0 = inlined_call_operand.vmem [shape: bf16[16,32], index: 0, kind: input, shape index: {}]   ;;  %s214_s2 = inlined_call_operand.vmem [shape: f32[1,128], index: 2, kind: input, shape index: {}]   ;;  %s215_s3 = inlined_call_operand.vmem [shape: bf16[16,128], index: 3, kind: output, shape index: {}]  }
   0x1   :  { %158 = vmatprep.subr.bf16.mxu0 %v175_v0  ;;  %v168_v1 = vld [vmem:[%s212_s1 + $0x8] sm:$0xff]   ;;  %162 = vmatprep.mubr.msk.bf16.mxu0 %vm176_vm0, %v175_v0  ;;  %v169_v2 = vld [vmem:[%s212_s1] sm:$0xff]  }
   0x2   :  { %159 = vmatpush3.bf16.msra.mxu0 %v168_v1  ;;  %v170_v3 = vld [vmem:[%s213_s0] sm:$0xff]  }
   0x3   :  { %160 = vmatprep.subr.bf16.mxu0 %v175_v0  ;;  %v145_v4 = vld [vmem:[%s214_s2] ss:$0 sm:$0xff] }
   0x6   :  { %161 = vmatpush3.bf16.msra.mxu0 %v169_v2 }
   0x9   :  { %163 = vmatmul.mubr.msk.bf16.vlgmr.msra.gmra.mxu0 %vm46_vm1, %v170_v3 }
  0xc9   :  { %v84_v5 = vpop.f32.mrf.mxu0 }
  0xca   :  { %v107_v6 = vadd.f32 %v145_v4, %v84_v5 }
  0xcb   :  { %v164_v7 = vpop.f32.mrf.mxu0 }
  0xcc   :  { %v111_v8 = vmul.f32 0.044715, %v107_v6  ;;  %v109_v24 = vmul.f32 0.5, %v107_v6 }
  0xcd   :  { %v87_v9 = vpop.f32.mrf.mxu0 }
  0xce   :  { %v113_v10 = vmul.f32 %v111_v8, %v107_v6  ;;  %v108_v11 = vadd.f32 %v145_v4, %v87_v9 }
  0xcf   :  { %v165_v12 = vpop.f32.mrf.mxu0 }
  0xd0   :  { %v115_v13 = vmul.f32 %v113_v10, %v107_v6  ;;  %v112_v14 = vmul.f32 0.044715, %v108_v11  ;;  %v110_v25 = vmul.f32 0.5, %v108_v11 }
  0xd2   :  { %v117_v15 = vadd.f32 %v115_v13, %v107_v6  ;;  %v114_v16 = vmul.f32 %v112_v14, %v108_v11 }
  0xd4   :  { %v119_v17 = vmul.f32 0.7978846, %v117_v15  ;;  %v116_v18 = vmul.f32 %v114_v16, %v108_v11 }
  0xd6   :  { %171 = vtanh.f32 %v119_v17  ;;  %v118_v19 = vadd.f32 %v116_v18, %v108_v11 }
  0xd8   :  { %v120_v20 = vmul.f32 0.7978846, %v118_v19 }
  0xda   :  { %173 = vtanh.f32 %v120_v20 }
  0xe3   :  { %v172_v21 = vpop.eup %171 }
  0xe4   :  { %v123_v22 = vadd.f32 1.0, %v172_v21 }
  0xe6   :  { %v125_v27 = vmul.f32 %v123_v22, %v109_v24 }
  0xe7   :  { %v174_v23 = vpop.eup %173 }
  0xe8   :  { %v124_v26 = vadd.f32 1.0, %v174_v23 }
  0xea   :  { %v126_v28 = vmul.f32 %v124_v26, %v110_v25 }
  0xec   :  { %v153_v29 = vpack.c.bf16 %v126_v28, %v125_v27 }
  0xee   :  { %154 = vst [vmem:[%s215_s3] sm:$0xff] %v153_v29  }

// kernel: bert_classifier_forward.17
= control target key start
LH: loop header
LB: loop body
LE: loop exit
PB: predicated region body
PF: predicated region fallthrough
CT: control target
= control target key end

     0   :  { %vm28_vm0 = vcmask 261120   ;;  %v295_v0 = vmov 0.0   ;;  %vm296_vm1 = vmmov 0   ;;  %vm224_vm2 = vcmask 257024   ;;  %s385_s1 = inlined_call_operand.vmem [shape: bf16[128,32], index: 1, kind: input, shape index: {}]   ;;  %s386_s0 = inlined_call_operand.vmem [shape: bf16[16,128], index: 0, kind: input, shape index: {}]   ;;  %s387_s3 = inlined_call_operand.vmem [shape: bf16[16,32], index: 3, kind: input, shape index: {}]   ;;  %s388_s2 = inlined_call_operand.vmem [shape: f32[1,32], index: 2, kind: input, shape index: {}]   ;;  %s389_s4 = inlined_call_operand.vmem [shape: f32[1,32], index: 4, kind: input, shape index: {}]   ;;  %s390_s5 = inlined_call_operand.vmem [shape: f32[1,32], index: 5, kind: input, shape index: {}]   ;;  %s391_s6 = inlined_call_operand.vmem [shape: bf16[16,32], index: 6, kind: output, shape index: {}]  }
   0x1   :  { %260 = vmatprep.subr.bf16.mxu0 %v295_v0  ;;  %v282_v1 = vld [vmem:[%s385_s1 + $0x38] sm:$0xff]   ;;  %276 = vmatprep.mubr.msk.bf16.mxu0 %vm296_vm1, %v295_v0  ;;  %29 = vst.msk [vmem:[#allocation2] sm:$0xff] %vm28_vm0, %v295_v0  ;;  %30 = vst.msk [vmem:[#allocation2 + $0x8] sm:$0xff] %vm28_vm0, %v295_v0  ;;  %v283_v2 = vld [vmem:[%s385_s1 + $0x30] sm:$0xff]  }
   0x2   :  { %261 = vmatpush3.bf16.msra.mxu0 %v282_v1  ;;  %v284_v3 = vld [vmem:[%s385_s1 + $0x28] sm:$0xff]   ;;  %v285_v4 = vld [vmem:[%s385_s1 + $0x20] sm:$0xff]   ;;  %v286_v5 = vld [vmem:[%s385_s1 + $0x18] sm:$0xff]  }
   0x3   :  { %262 = vmatprep.subr.bf16.mxu0 %v295_v0  ;;  %v287_v6 = vld [vmem:[%s385_s1 + $0x10] sm:$0xff]   ;;  %v288_v7 = vld [vmem:[%s385_s1 + $0x8] sm:$0xff]   ;;  %v289_v8 = vld [vmem:[%s385_s1] sm:$0xff]  }
   0x4   :  { %v290_v9 = vld [vmem:[%s386_s0] sm:$0xff]  }
   0x5   :  { %v248_v18 = vld [vmem:[%s387_s3] sm:$0xff]  }
   0x6   :  { %263 = vmatpush3.bf16.msra.mxu0 %v283_v2  ;;  %v240_v19 = vld [vmem:[%s388_s2] ss:$0 sm:$0xff]  ;;  %v249_v20 = vunpack.c.l.bf16 %v248_v18  ;;  %v250_v24 = vunpack.c.h.bf16 %v248_v18 }
   0x7   :  { %264 = vmatprep.subr.bf16.mxu0 %v295_v0  ;;  %v241_v47 = vld [vmem:[%s389_s4] ss:$0 sm:$0xff] }
   0x8   :  { %v31_v10 = vld [vmem:[#allocation2] sm:$0xff]  ;;  %v32_v14 = vld [vmem:[#allocation2 + $0x8] sm:$0xff] }
   0x9   :  { %v242_v49 = vld [vmem:[%s390_s5] ss:$0 sm:$0xff] }
   0xa   :  { %265 = vmatpush3.bf16.msra.mxu0 %v284_v3 }
   0xb   :  { %266 = vmatprep.subr.bf16.mxu0 %v295_v0 }
   0xe   :  { %267 = vmatpush3.bf16.msra.mxu0 %v285_v4 }
   0xf   :  { %268 = vmatprep.subr.bf16.mxu0 %v295_v0 }
  0x12   :  { %269 = vmatpush3.bf16.msra.mxu0 %v286_v5 }
  0x13   :  { %270 = vmatprep.subr.bf16.mxu0 %v295_v0 }
  0x16   :  { %271 = vmatpush3.bf16.msra.mxu0 %v287_v6 }
  0x17   :  { %272 = vmatprep.subr.bf16.mxu0 %v295_v0 }
  0x1a   :  { %273 = vmatpush3.bf16.msra.mxu0 %v288_v7 }
  0x1b   :  { %274 = vmatprep.subr.bf16.mxu0 %v295_v0 }
  0x1e   :  { %275 = vmatpush3.bf16.msra.mxu0 %v289_v8 }
  0x21   :  { %277 = vmatmul.mubr.bf16.vlgmr.msra.gmra.mxu0 %v290_v9 }
  0xe1   :  { %v139_v11 = vpop.f32.mrf.mxu0 }
  0xe2   :  { %v146_v12 = vadd.f32 %v139_v11, %v31_v10 }
  0xe3   :  { %v278_v13 = vpop.f32.mrf.mxu0 }
  0xe4   :  { %149 = vst.msk [vmem:[#allocation2] sm:$0xff] %vm28_vm0, %v146_v12 }
  0xe5   :  { %v142_v15 = vpop.f32.mrf.mxu0 }
  0xe6   :  { %v147_v16 = vadd.f32 %v142_v15, %v32_v14 }
  0xe7   :  { %v279_v17 = vpop.f32.mrf.mxu0 }
  0xe8   :  { %150 = vst.msk [vmem:[#allocation2 + $0x8] sm:$0xff] %vm28_vm0, %v147_v16 }
  0xeb   :  { %v154_v21 = vld [vmem:[#allocation2] sm:$0xff] }
  0xec   :  { %v163_v22 = vadd.f32 %v240_v19, %v154_v21 }
  0xee   :  { %v169_v23 = vadd.f32 %v249_v20, %v163_v22 }
  0xef   :  { %v155_v25 = vld [vmem:[#allocation2 + $0x8] sm:$0xff] }
  0xf0   :  { %v171_v26 = vsel %vm28_vm0, %v169_v23, 0.0  ;;  %v164_v27 = vadd.f32 %v240_v19, %v155_v25 }
  0xf1   :  { %172 = vadd.xlane.f32.xlu0 %v171_v26 }
  0xf2   :  { %v170_v28 = vadd.f32 %v250_v24, %v164_v27 }
  0xf4   :  { %v174_v29 = vsel %vm28_vm0, %v170_v28, 0.0 }
  0xf5   :  { %175 = vadd.xlane.f32.xlu0 %v174_v29 }
 0x17a   :  { %v173_v30 = vpop.xlane.xlu0 %172 }
 0x17b   :  { %v178_v31 = vmul.f32 0.03125, %v173_v30 }
 0x17d   :  { %v180_v32 = vsub.f32 %v169_v23, %v178_v31 }
 0x17e   :  { %v176_v33 = vpop.xlane.xlu0 %175 }
 0x17f   :  { %v179_v34 = vmul.f32 0.03125, %v176_v33  ;;  %v182_v35 = vmul.f32 %v180_v32, %v180_v32 }
 0x181   :  { %v181_v36 = vsub.f32 %v170_v28, %v179_v34  ;;  %v184_v37 = vsel %vm28_vm0, %v182_v35, 0.0 }
 0x182   :  { %185 = vadd.xlane.f32.xlu1 %v184_v37 }
 0x183   :  { %v183_v38 = vmul.f32 %v181_v36, %v181_v36 }
 0x185   :  { %v187_v39 = vsel %vm28_vm0, %v183_v38, 0.0 }
 0x186   :  { %188 = vadd.xlane.f32.xlu1 %v187_v39 }
 0x20b   :  { %v186_v40 = vpop.xlane.xlu1 %185 }
 0x20c   :  { %v190_v41 = vmul.f32 0.03125, %v186_v40 }
 0x20e   :  { %v192_v42 = vadd.f32 1e-12, %v190_v41 }
 0x20f   :  { %v189_v43 = vpop.xlane.xlu1 %188 }
 0x210   :  { %291 = vrsqrt.f32 %v192_v42  ;;  %v191_v44 = vmul.f32 0.03125, %v189_v43 }
 0x212   :  { %v193_v45 = vadd.f32 1e-12, %v191_v44 }
 0x214   :  { %293 = vrsqrt.f32 %v193_v45 }
 0x21d   :  { %v292_v46 = vpop.eup %291 }
 0x21e   :  { %v196_v48 = vmul.f32 %v292_v46, %v180_v32 }
 0x220   :  { %v205_v50 = vmul.f32 %v241_v47, %v196_v48 }
 0x221   :  { %v294_v51 = vpop.eup %293 }
 0x222   :  { %v214_v52 = vadd.f32 %v242_v49, %v205_v50  ;;  %v197_v53 = vmul.f32 %v294_v51, %v181_v36 }
 0x224   :  { %v245_v54 = vpack.c.bf16 %v214_v52, %v214_v52  ;;  %v206_v55 = vmul.f32 %v241_v47, %v197_v53 }
 0x226   :  { %225 = vst.msk [vmem:[%s391_s6] sm:$0xf] %vm224_vm2, %v245_v54  ;;  %v215_v56 = vadd.f32 %v242_v49, %v206_v55 }
 0x228   :  { %v246_v57 = vpack.c.bf16 %v215_v56, %v215_v56 }
 0x22a   :  { %226 = vst.msk [vmem:[%s391_s6 + $0x4] sm:$0xf] %vm224_vm2, %v246_v57 }

// kernel: bert_classifier_forward.23
= control target key start
LH: loop header
LB: loop body
LE: loop exit
PB: predicated region body
PF: predicated region fallthrough
CT: control target
= control target key end

     0   :  { %v606_v1 = vmov 0.0   ;;  %vm607_vm0 = vmmov 0   ;;  %vm64_vm1 = vcmask 261120   ;;  %s786_s0 = inlined_call_operand.vmem [shape: bf16[2,32], index: 0, kind: input, shape index: {}]   ;;  %s787_s1 = inlined_call_operand.vmem [shape: bf16[32,32], index: 1, kind: input, shape index: {}]   ;;  %s788_s2 = inlined_call_operand.vmem [shape: f32[1,32], index: 2, kind: input, shape index: {}]   ;;  %s789_s3 = inlined_call_operand.vmem [shape: f32[1,32], index: 3, kind: input, shape index: {}]   ;;  %s790_s4 = inlined_call_operand.vmem [shape: f32[1,32], index: 4, kind: input, shape index: {}]   ;;  %s791_s5 = inlined_call_operand.vmem [shape: bf16[32,128], index: 5, kind: input, shape index: {}]   ;;  %s792_s6 = inlined_call_operand.vmem [shape: f32[1,128], index: 6, kind: input, shape index: {}]   ;;  %s793_s7 = inlined_call_operand.vmem [shape: bf16[128,128], index: 7, kind: input, shape index: {}]   ;;  %s794_s8 = inlined_call_operand.vmem [shape: f32[1,128], index: 8, kind: input, shape index: {}]   ;;  %s795_s9 = inlined_call_operand.vmem [shape: bf16[128,32], index: 9, kind: input, shape index: {}]   ;;  %s796_s10 = inlined_call_operand.vmem [shape: f32[1,32], index: 10, kind: input, shape index: {}]   ;;  %s797_s11 = inlined_call_operand.hbm [shape: f32[2,32], index: 11, kind: output, shape index: {}]  }
   0x1   :  { %v560_v0 = vld [vmem:[%s787_s1 + $0x8] sm:$0xff]   ;;  %501 = vmatprep.subr.bf16.mxu0 %v606_v1  ;;  %509 = vmatprep.subr.bf16.mxu1 %v606_v1  ;;  %v561_v2 = vld [vmem:[%s787_s1] sm:$0xff]  }
   0x2   :  { %502 = vmatpush3.bf16.msra.mxu0 %v560_v0  ;;  %505 = vmatprep.mubr.msk.bf16.mxu0 %vm607_vm0, %v606_v1  ;;  %v40_v3 = vld [vmem:[%s786_s0] sm:$0x1] }
   0x3   :  { %503 = vmatprep.subr.bf16.mxu0 %v606_v1  ;;  %513 = vmatprep.mubr.msk.bf16.mxu1 %vm607_vm0, %v606_v1 }
   0x6   :  { %504 = vmatpush3.bf16.msra.mxu0 %v561_v2 }
   0x7   :  { %517 = vmatprep.subr.bf16.mxu0 %v606_v1 }
   0x9   :  { %506 = vmatmul.mubr.msk.bf16.vlgmr.msra.gmra.mxu0 %vm64_vm1, %v40_v3 }
   0xa   :  { %533 = vmatprep.mubr.msk.bf16.mxu0 %vm607_vm0, %v606_v1 }
   0xb   :  { %16 = vsyncpa [#allocation3], 0  ;;  %v449_v4 = vld [vmem:[%s788_s2] ss:$0 sm:$0xff]  ;;  %vm109_vm2 = vcmask 254976   ;;  %v562_v17 = vld [vmem:[%s791_s5 + $0x8] sm:$0xff]  }
   0xc   :  { %510 = vmatpush3.bf16.msra.mxu1 %v562_v17  ;;  %v563_v18 = vld [vmem:[%s791_s5] sm:$0xff]   ;;  %v564_v19 = vld [vmem:[%s793_s7 + $0x38] sm:$0xff]   ;;  %v565_v20 = vld [vmem:[%s793_s7 + $0x30] sm:$0xff]   ;;  %s608_s21 = smov [#allocation2]  }
   0xd   :  { %511 = vmatprep.subr.bf16.mxu1 %v606_v1  ;;  %518 = vmatpush3.bf16.msra.mxu0 %v564_v19  ;;  %v566_v21 = vld [vmem:[%s793_s7 + $0x28] sm:$0xff]   ;;  %v567_v22 = vld [vmem:[%s793_s7 + $0x20] sm:$0xff]   ;;  %v568_v23 = vld [vmem:[%s793_s7 + $0x18] sm:$0xff]  }
   0xe   :  { %519 = vmatprep.subr.bf16.mxu0 %v606_v1  ;;  %v569_v24 = vld [vmem:[%s793_s7 + $0x10] sm:$0xff]   ;;  %v453_v29 = vld [vmem:[%s789_s3] ss:$0 sm:$0xff]  ;;  %v570_v35 = vld [vmem:[%s793_s7 + $0x8] sm:$0xff]  }
   0xf   :  { %v454_v31 = vld [vmem:[%s790_s4] ss:$0 sm:$0xff]  ;;  %v572_v37 = vld [vmem:[%s795_s9 + $0x38] sm:$0xff]   ;;  %v573_v38 = vld [vmem:[%s795_s9 + $0x30] sm:$0xff]  }
  0x10   :  { %512 = vmatpush3.bf16.msra.mxu1 %v563_v18  ;;  %v571_v36 = vld [vmem:[%s793_s7] sm:$0xff]   ;;  %v574_v39 = vld [vmem:[%s795_s9 + $0x28] sm:$0xff]   ;;  %v576_v41 = vld [vmem:[%s795_s9 + $0x18] sm:$0xff]  }
  0x11   :  { %537 = vmatprep.subr.bf16.mxu1 %v606_v1  ;;  %520 = vmatpush3.bf16.msra.mxu0 %v565_v20  ;;  %v575_v40 = vld [vmem:[%s795_s9 + $0x20] sm:$0xff]   ;;  %v577_v42 = vld [vmem:[%s795_s9 + $0x10] sm:$0xff]   ;;  %v578_v51 = vld [vmem:[%s795_s9 + $0x8] sm:$0xff]  }
  0x12   :  { %521 = vmatprep.subr.bf16.mxu0 %v606_v1  ;;  %v455_v43 = vld [vmem:[%s792_s6] ss:$0 sm:$0xff] }
  0x13   :  { %v579_v52 = vld [vmem:[%s795_s9] sm:$0xff]   ;;  %s441_s9 = sshll.u32 %s608_s21, 4  ;;  %s442_s9 = int_to_ptr.vmem [resolvable:$true] %s441_s9 }
  0x14   :  { %v459_v53 = vld [vmem:[%s794_s8] ss:$0 sm:$0xff]  ;;  %s584_s8 = scalar_lea.vmem %s442_s9, 32  ;;  %p589_p1 = scmp.lt.s32.totalorder %s442_s9, %s442_s9 }
  0x15   :  { %522 = vmatpush3.bf16.msra.mxu0 %v566_v21  ;;  %v468_v61 = vld [vmem:[%s796_s10] ss:$0 sm:$0xff]  ;;  %p585_p0 = scmp.ne.s32.totalorder %s442_s9, %s584_s8  ;;  %p590_p2 = scmp.lt.s32.totalorder %s584_s8, %s584_s8 }
  0x16   :  { %523 = vmatprep.subr.bf16.mxu0 %v606_v1 }
  0x17   :  { %p591_p3 = por %p590_p2, %p589_p1 }
  0x19   :  { %524 = vmatpush3.bf16.msra.mxu0 %v567_v22  ;;  %p592_p4 = pnand %p591_p3, %p585_p0 }
  0x1a   :  { %525 = vmatprep.subr.bf16.mxu0 %v606_v1 }
  0x1d   :  { %526 = vmatpush3.bf16.msra.mxu0 %v568_v23 }
  0x1e   :  { %527 = vmatprep.subr.bf16.mxu0 %v606_v1 }
  0x21   :  { %528 = vmatpush3.bf16.msra.mxu0 %v569_v24 }
  0x22   :  { %529 = vmatprep.subr.bf16.mxu0 %v606_v1 }
  0x25   :  { %530 = vmatpush3.bf16.msra.mxu0 %v570_v35 }
  0x26   :  { %531 = vmatprep.subr.bf16.mxu0 %v606_v1 }
  0x29   :  { %532 = vmatpush3.bf16.msra.mxu0 %v571_v36 }
  0xc9   :  { %v102_v5 = vpop.f32.mrf.mxu0 }
  0xca   :  { %v103_v6 = vadd.f32 %v449_v4, %v102_v5 }
  0xcb   :  { %v507_v7 = vpop.f32.mrf.mxu0 }
  0xcc   :  { %580 = vtanh.f32 %v103_v6 }
  0xcd   :  { %v105_v8 = vpop.f32.mrf.mxu0 }
  0xcf   :  { %v508_v9 = vpop.f32.mrf.mxu0 }
  0xd9   :  { %v581_v10 = vpop.eup %580 }
  0xda   :  { %v110_v11 = vsel %vm109_vm2, %v581_v10, 0.0 }
  0xdb   :  { %111 = vadd.xlane.f32.xlu0 %v110_v11 }
 0x164   :  { %v112_v12 = vpop.xlane.xlu0 %111 }
 0x165   :  { %v114_v13 = vmul.f32 0.03125, %v112_v12 }
 0x167   :  { %v115_v14 = vsub.f32 %v581_v10, %v114_v13 }
 0x169   :  { %v116_v15 = vmul.f32 %v115_v14, %v115_v14 }
 0x16b   :  { %v117_v16 = vsel %vm109_vm2, %v116_v15, 0.0 }
 0x16c   :  { %118 = vadd.xlane.f32.xlu0 %v117_v16 }
 0x1f5   :  { %v119_v25 = vpop.xlane.xlu0 %118 }
 0x1f6   :  { %v120_v26 = vmul.f32 0.03125, %v119_v25 }
 0x1f8   :  { %v121_v27 = vadd.f32 1e-05, %v120_v26 }
 0x1fa   :  { %582 = vrsqrt.f32 %v121_v27 }
 0x207   :  { %v583_v28 = vpop.eup %582 }
 0x208   :  { %v123_v30 = vmul.f32 %v583_v28, %v115_v14 }
 0x20a   :  { %v131_v32 = vmul.f32 %v453_v29, %v123_v30 }
 0x20c   :  { %v139_v33 = vadd.f32 %v454_v31, %v131_v32 }
 0x20e   :  { %v140_v34 = vpack.c.bf16 %v139_v33, %v139_v33 }
 0x210   :  { %514 = vmatmul.mubr.msk.bf16.vlgmr.msra.gmra.mxu1 %vm64_vm1, %v140_v34 }
 0x211   :  { %553 = vmatprep.mubr.msk.bf16.mxu1 %vm607_vm0, %v606_v1  ;;  %538 = vmatpush3.bf16.msra.mxu1 %v572_v37 }
 0x212   :  { %539 = vmatprep.subr.bf16.mxu1 %v606_v1 }
 0x215   :  { %540 = vmatpush3.bf16.msra.mxu1 %v573_v38 }
 0x216   :  { %541 = vmatprep.subr.bf16.mxu1 %v606_v1 }
 0x219   :  { %542 = vmatpush3.bf16.msra.mxu1 %v574_v39 }
 0x21a   :  { %543 = vmatprep.subr.bf16.mxu1 %v606_v1 }
 0x21d   :  { %544 = vmatpush3.bf16.msra.mxu1 %v575_v40 }
 0x21e   :  { %545 = vmatprep.subr.bf16.mxu1 %v606_v1 }
 0x221   :  { %546 = vmatpush3.bf16.msra.mxu1 %v576_v41 }
 0x222   :  { %547 = vmatprep.subr.bf16.mxu1 %v606_v1 }
 0x225   :  { %548 = vmatpush3.bf16.msra.mxu1 %v577_v42 }
 0x226   :  { %549 = vmatprep.subr.bf16.mxu1 %v606_v1 }
 0x229   :  { %550 = vmatpush3.bf16.msra.mxu1 %v578_v51 }
 0x22a   :  { %551 = vmatprep.subr.bf16.mxu1 %v606_v1 }
 0x22d   :  { %552 = vmatpush3.bf16.msra.mxu1 %v579_v52 }
 0x2d0   :  { %v201_v44 = vpop.f32.mrf.mxu1 }
 0x2d1   :  { %v202_v45 = vadd.f32 %v455_v43, %v201_v44 }
 0x2d2   :  { %v515_v46 = vpop.f32.mrf.mxu1 }
 0x2d3   :  { %v207_v47 = vmax.f32 %v202_v45, 0.0 }
 0x2d4   :  { %v204_v48 = vpop.f32.mrf.mxu1 }
 0x2d5   :  { %v208_v49 = vpack.c.bf16 %v207_v47, %v207_v47 }
 0x2d6   :  { %v516_v50 = vpop.f32.mrf.mxu1 }
 0x2d7   :  { %534 = vmatmul.mubr.bf16.vlgmr.msra.gmra.mxu0 %v208_v49 }
 0x397   :  { %v314_v54 = vpop.f32.mrf.mxu0 }
 0x398   :  { %v315_v55 = vadd.f32 %v459_v53, %v314_v54 }
 0x399   :  { %v535_v56 = vpop.f32.mrf.mxu0 }
 0x39a   :  { %v320_v57 = vmax.f32 %v315_v55, 0.0 }
 0x39b   :  { %v317_v58 = vpop.f32.mrf.mxu0 }
 0x39c   :  { %v321_v59 = vpack.c.bf16 %v320_v57, %v320_v57 }
 0x39d   :  { %v536_v60 = vpop.f32.mrf.mxu0 }
 0x39e   :  { %554 = vmatmul.mubr.bf16.vlgmr.msra.gmra.mxu1 %v321_v59 }
 0x45e   :  { %v427_v62 = vpop.f32.mrf.mxu1 }
 0x45f   :  { %v428_v63 = vadd.f32 %v468_v61, %v427_v62 }
 0x460   :  { %v555_v0 = vpop.f32.mrf.mxu1 }
 0x461   :  { %v433_v1 = vmax.f32 %v428_v63, 0.0 }
 0x462   :  { %v430_v2 = vpop.f32.mrf.mxu1 }
 0x463   :  { %434 = vst.msk [vmem:[#allocation2] sm:$0x3] %vm109_vm2, %v433_v1 }
 0x464   :  { %v556_v3 = vpop.f32.mrf.mxu1 }
 0x465   :  { %595 = shalt.err (!%p592_p4)
}
 0x466   :  { %444 = dma.vmem_to_hbm [thread:$0]  %s442_s9, 32, %s797_s11, [#allocation3]  }
 0x467   :  { %604 = dma.done.wait [#allocation3], 32  }
 0x468   :  { %605 = vsyncadd [#allocation3], 4294967264 }
 0x469   :  { %448 = vsyncpa [#allocation3], 1 }

</bundles_post_ra>
